<compile_context>
chip_gen: v5e
topology: v5e:2x2
jax: 0.10.0
libtpu: 0.0.40
codegen_flags: <defaults>
</compile_context>

<pallas_src>
import jax
import jax.numpy as jnp
import numpy as np
from jax.experimental import pallas as pl
from jax.experimental.pallas import tpu as pltpu

NUM_FRENCH_WORDS = 256   # vocabulary size (small synthetic value)
PADDING_TOKEN = 0


# ----------------------------------------------------------------------------
# Pallas kernel: hoisted (embedding ∘ layer-0 input proj) for all timesteps
#                + wavefronted stacked fused-gate GRU
#                + one batched output Linear after the recurrence.
# ----------------------------------------------------------------------------
def decoder_kernel(ids_ref,      # (T*B, 1)   int32  time-major flat: row t*B + b
                   wx0_ref,      # (V, 3H)    f32    emb_table @ W_ih(layer 0), [r|z|n]
                   wih_ref,      # (L, H, 3H) f32    [r|z|n]; row 0 unused (folded in wx0)
                   whh_ref,      # (L, H, 3H) f32    [r|z|n]
                   bx_ref,       # (L, 1, 3H) f32    b_ih + [b_hr | b_hz | 0]
                   bhn_ref,      # (L, 1, H)  f32    b_hn (stays separate: gated by r)
                   wout_ref,     # (H, V)     f32    pre-transposed
                   bout_ref,     # (1, V)     f32
                   h0_ref,       # (L, B, H)  f32
                   logits_ref,   # (T*B, V)   f32    output, time-major flat
                   hn_ref,       # (L, B, H)  f32    output
                   seq):         # (T*B, H)   f32    VMEM scratch: last-layer hiddens
    TB = ids_ref.shape[0]
    V = wx0_ref.shape[0]
    L, B, H = h0_ref.shape
    T = TB // B

    # ---- Hoisted per-layer weights / biases (loaded once) -------------------
    whh = [whh_ref[l] for l in range(L)]                         # (H, 3H)
    bhn = [bhn_ref[l] for l in range(L)]                         # (1, H)
    bx = [bx_ref[l] for l in range(L)]                           # (1, 3H)
    wih = [None] + [wih_ref[l] for l in range(1, L)]             # (H, 3H), l >= 1

    # ---- Layer-0 x-side gates for ALL timesteps: ONE batched matmul ----------
    #   emb(x) @ W_ih0 == onehot(x) @ (emb_table @ W_ih0)  (wx0 built in prep).
    # Exact because one-hot is an exact row select and the padding row of emb is
    # zero.  Out-of-range ids give an all-zero row instead of raising like torch.
    iota_v = jax.lax.broadcasted_iota(jnp.int32, (TB, V), 1)
    onehot = (ids_ref[...] == iota_v).astype(jnp.float32)        # (T*B, V)
    gx0_all = jnp.dot(onehot, wx0_ref[...],
                      preferred_element_type=jnp.float32) + bx[0]  # (T*B, 3H)

    def gru_cell(gx, gh, h_prev, b_hn):
        # PyTorch gate order r, z, n.  s = gx + gh once; only n needs split slices.
        s = gx + gh
        r = jax.nn.sigmoid(s[:, :H])
        z = jax.nn.sigmoid(s[:, H:2 * H])
        n = jnp.tanh(gx[:, 2 * H:] + r * (gh[:, 2 * H:] + b_hn))
        return (1.0 - z) * n + z * h_prev

    # ---- Wavefront over (layer, timestep), fully unrolled (T, L static) ------
    # In wave w, layer l processes timestep t = w - l; layer l-1's output at t was
    # produced in wave w-1 and is consumed directly as an SSA value, so the
    # dependent chain is T + L - 1 GRU steps instead of L * T.
    h = [h0_ref[l] for l in range(L)]                            # carried states
    x_in = [[None] * T for _ in range(L)]                        # inter-layer SSA

    for w in range(T + L - 1):
        for l in range(L):
            t = w - l
            if not (0 <= t < T):
                continue
            if l == 0:
                gx = gx0_all[t * B:(t + 1) * B, :]               # static row slice
            else:
                gx = jnp.dot(x_in[l][t], wih[l],
                             preferred_element_type=jnp.float32) + bx[l]
            gh = jnp.dot(h[l], whh[l], preferred_element_type=jnp.float32)
            h_new = gru_cell(gx, gh, h[l], bhn[l])
            h[l] = h_new
            if l + 1 < L:
                x_in[l + 1][t] = h_new                           # next layer's input
            else:
                seq[pl.ds(t * B, B), :] = h_new                  # stage for out-proj

    # ---- Output projection: ONE (T*B,H)@(H,V) matmul, one dense store --------
    logits_ref[...] = (jnp.dot(seq[...], wout_ref[...],
                               preferred_element_type=jnp.float32)
                       + bout_ref[...])
    for l in range(L):
        hn_ref[l] = h[l]


# ----------------------------------------------------------------------------
# One-time parameter preparation (opt: do NOT repack weights on every call)
# ----------------------------------------------------------------------------
def prepare_params(params):
    """Fuse gate weights to [r|z|n], fold biases, fold embedding into layer 0."""
    emb = params["emb"]
    wih, whh, bih, bhh = params["wih"], params["whh"], params["bih"], params["bhh"]
    wih_cat = jnp.concatenate([wih[:, 0], wih[:, 1], wih[:, 2]], axis=-1)   # (L,E,3H)
    whh_cat = jnp.concatenate([whh[:, 0], whh[:, 1], whh[:, 2]], axis=-1)   # (L,H,3H)
    bx = jnp.concatenate([bih[:, 0] + bhh[:, 0],
                          bih[:, 1] + bhh[:, 1],
                          bih[:, 2]], axis=-1)                              # (L,1,3H)
    bhn = bhh[:, 2]                                                         # (L,1,H)
    wx0 = jnp.dot(emb, wih_cat[0], preferred_element_type=jnp.float32)      # (V,3H)
    return dict(wx0=wx0, wih=wih_cat, whh=whh_cat, bx=bx, bhn=bhn,
                wout=params["wout"], bout=params["bout"])


# ----------------------------------------------------------------------------
# Wrapper
# ----------------------------------------------------------------------------
def decoder_forward(X, prep, input_hidden_state=None):
    """X: (B, T) or (T,) int32 token ids.  Returns (logits (B,T,V), hN (L,B,H))."""
    if X.ndim == 1:                        # mirrors the X.dim() > 1 branch
        X = X[None, :]
    B, T = X.shape
    wx0, wih, whh, bx, bhn = prep["wx0"], prep["wih"], prep["whh"], prep["bx"], prep["bhn"]
    wout, bout = prep["wout"], prep["bout"]
    L, H = whh.shape[0], whh.shape[1]
    V = wx0.shape[0]

    if input_hidden_state is None:
        h0 = jnp.zeros((L, B, H), jnp.float32)
    else:
        h0 = input_hidden_state.astype(jnp.float32)

    # Time-major flattened ids: row t*B + b  <->  X[b, t].
    ids = jnp.transpose(X.astype(jnp.int32), (1, 0)).reshape(T * B, 1)

    vmem = pl.BlockSpec(memory_space=pltpu.MemorySpace.VMEM)
    out_shape = (jax.ShapeDtypeStruct((T * B, V), jnp.float32),
                 jax.ShapeDtypeStruct((L, B, H), jnp.float32))

    logits_flat, hn = pl.pallas_call(
        decoder_kernel,
        out_shape=out_shape,
        in_specs=[vmem] * 9,
        out_specs=(vmem, vmem),
        scratch_shapes=[pltpu.VMEM((T * B, H), jnp.float32)],
    )(ids, wx0, wih, whh, bx, bhn, wout, bout, h0)

    logits = jnp.transpose(logits_flat.reshape(T, B, V), (1, 0, 2))          # (B,T,V)
    return logits, hn


# ----------------------------------------------------------------------------
# Deterministic parameter init (shapes from the nn.Module __init__)
# ----------------------------------------------------------------------------
def init_params(key, vocab, embedding_size, hidden_size, num_layers,
                padding_token=PADDING_TOKEN):
    V, E, H, L = vocab, embedding_size, hidden_size, num_layers
    ks = jax.random.split(key, 8)
    scale = 1.0 / np.sqrt(H)

    emb = jax.random.normal(ks[0], (V, E), jnp.float32)
    emb = emb.at[padding_token].set(0.0)           # padding_idx row is zero

    # Stored pre-transposed so everything is x @ w (== x @ W^T in torch).
    wih = jax.random.uniform(ks[1], (L, 3, E, H), jnp.float32, -scale, scale)
    whh = jax.random.uniform(ks[2], (L, 3, H, H), jnp.float32, -scale, scale)
    bih = jax.random.uniform(ks[3], (L, 3, 1, H), jnp.float32, -scale, scale)
    bhh = jax.random.uniform(ks[4], (L, 3, 1, H), jnp.float32, -scale, scale)
    wout = jax.random.uniform(ks[5], (H, V), jnp.float32, -scale, scale)
    bout = jax.random.uniform(ks[6], (1, V), jnp.float32, -scale, scale)
    return dict(emb=emb, wih=wih, whh=whh, bih=bih, bhh=bhh, wout=wout, bout=bout)


# ----------------------------------------------------------------------------
# Pure-JAX reference (same semantics as the PyTorch module in eval mode)
# ----------------------------------------------------------------------------
def reference_forward(X, params, h0):
    B, T = X.shape
    wih, whh, bih, bhh = params["wih"], params["whh"], params["bih"], params["bhh"]
    L, _, E, H = wih.shape
    x = params["emb"][X]                                              # (B, T, E)
    hs = []
    for l in range(L):
        h = h0[l]
        outs = []
        for t in range(T):
            xt = x[:, t, :]
            r = jax.nn.sigmoid(xt @ wih[l, 0] + bih[l, 0] + h @ whh[l, 0] + bhh[l, 0])
            z = jax.nn.sigmoid(xt @ wih[l, 1] + bih[l, 1] + h @ whh[l, 1] + bhh[l, 1])
            n = jnp.tanh(xt @ wih[l, 2] + bih[l, 2] + r * (h @ whh[l, 2] + bhh[l, 2]))
            h = (1.0 - z) * n + z * h
            outs.append(h)
        x = jnp.stack(outs, axis=1)                                   # (B, T, H)
        hs.append(h)
    logits = x @ params["wout"] + params["bout"]                      # (B, T, V)
    return logits, jnp.stack(hs, axis=0)


if __name__ == "__main__":
    embedding_size = 32
    hidden_size = 32
    num_layers = 2
    dropout_prob = 0.1       # inactive at inference
    B, T = 2, 8

    key = jax.random.PRNGKey(0)
    pkey, xkey = jax.random.split(key)
    params = init_params(pkey, NUM_FRENCH_WORDS, embedding_size,
                         hidden_size, num_layers)
    prep = prepare_params(params)            # one-time weight repack / folding

    X = jax.random.randint(xkey, (B, T), 0, NUM_FRENCH_WORDS, dtype=jnp.int32)
    X = X.at[:, -2:].set(PADDING_TOKEN)      # include some padding tokens

    logits, hidden = decoder_forward(X, prep, None)
    jax.block_until_ready((logits, hidden))

    h0 = jnp.zeros((num_layers, B, hidden_size), jnp.float32)
    ref_logits, ref_hidden = reference_forward(X, params, h0)
    np.testing.assert_allclose(np.asarray(logits), np.asarray(ref_logits),
                               rtol=1e-4, atol=1e-4)
    np.testing.assert_allclose(np.asarray(hidden), np.asarray(ref_hidden),
                               rtol=1e-4, atol=1e-4)

    assert logits.shape == (B, T, NUM_FRENCH_WORDS)
    assert hidden.shape == (num_layers, B, hidden_size)
    print("KERNEL_OK")
</pallas_src>

<mosaic_0001>
module attributes {stable_mosaic.version = 11 : i64} {
  func.func @decoder_kernel(%arg0: memref<16x1xi32, #tpu.memory_space<vmem>>, %arg1: memref<256x96xf32, #tpu.memory_space<vmem>>, %arg2: memref<2x32x96xf32, #tpu.memory_space<vmem>>, %arg3: memref<2x32x96xf32, #tpu.memory_space<vmem>>, %arg4: memref<2x1x96xf32, #tpu.memory_space<vmem>>, %arg5: memref<2x1x32xf32, #tpu.memory_space<vmem>>, %arg6: memref<32x256xf32, #tpu.memory_space<vmem>>, %arg7: memref<1x256xf32, #tpu.memory_space<vmem>>, %arg8: memref<2x2x32xf32, #tpu.memory_space<vmem>>, %arg9: memref<16x256xf32, #tpu.memory_space<vmem>>, %arg10: memref<2x2x32xf32, #tpu.memory_space<vmem>>, %arg11: memref<16x32xf32, #tpu.memory_space<vmem>>) attributes {dimension_semantics = [], scalar_prefetch = 0 : i64, scratch_operands = 1 : i64, tpu.core_type = #tpu.core_type<tc>} {
    %c0 = arith.constant 0 : index
    %c0_0 = arith.constant 0 : index
    %c0_1 = arith.constant 0 : index
    %0 = vector.load %arg3[%c0, %c0_0, %c0_1] : memref<2x32x96xf32, #tpu.memory_space<vmem>>, vector<1x32x96xf32>
    %1 = vector.shape_cast %0 : vector<1x32x96xf32> to vector<32x96xf32>
    %c1 = arith.constant 1 : index
    %c0_2 = arith.constant 0 : index
    %c0_3 = arith.constant 0 : index
    %2 = vector.load %arg3[%c1, %c0_2, %c0_3] : memref<2x32x96xf32, #tpu.memory_space<vmem>>, vector<1x32x96xf32>
    %3 = vector.shape_cast %2 : vector<1x32x96xf32> to vector<32x96xf32>
    %c0_4 = arith.constant 0 : index
    %c0_5 = arith.constant 0 : index
    %c0_6 = arith.constant 0 : index
    %4 = vector.load %arg5[%c0_4, %c0_5, %c0_6] : memref<2x1x32xf32, #tpu.memory_space<vmem>>, vector<1x1x32xf32>
    %5 = vector.shape_cast %4 : vector<1x1x32xf32> to vector<1x32xf32>
    %c1_7 = arith.constant 1 : index
    %c0_8 = arith.constant 0 : index
    %c0_9 = arith.constant 0 : index
    %6 = vector.load %arg5[%c1_7, %c0_8, %c0_9] : memref<2x1x32xf32, #tpu.memory_space<vmem>>, vector<1x1x32xf32>
    %7 = vector.shape_cast %6 : vector<1x1x32xf32> to vector<1x32xf32>
    %c0_10 = arith.constant 0 : index
    %c0_11 = arith.constant 0 : index
    %c0_12 = arith.constant 0 : index
    %8 = vector.load %arg4[%c0_10, %c0_11, %c0_12] : memref<2x1x96xf32, #tpu.memory_space<vmem>>, vector<1x1x96xf32>
    %9 = vector.shape_cast %8 : vector<1x1x96xf32> to vector<1x96xf32>
    %c1_13 = arith.constant 1 : index
    %c0_14 = arith.constant 0 : index
    %c0_15 = arith.constant 0 : index
    %10 = vector.load %arg4[%c1_13, %c0_14, %c0_15] : memref<2x1x96xf32, #tpu.memory_space<vmem>>, vector<1x1x96xf32>
    %11 = vector.shape_cast %10 : vector<1x1x96xf32> to vector<1x96xf32>
    %c1_16 = arith.constant 1 : index
    %c0_17 = arith.constant 0 : index
    %c0_18 = arith.constant 0 : index
    %12 = vector.load %arg2[%c1_16, %c0_17, %c0_18] : memref<2x32x96xf32, #tpu.memory_space<vmem>>, vector<1x32x96xf32>
    %13 = vector.shape_cast %12 : vector<1x32x96xf32> to vector<32x96xf32>
    %14 = tpu.iota {dimensions = array<i32: 1>} : vector<16x256xi32>
    %c0_19 = arith.constant 0 : index
    %c0_20 = arith.constant 0 : index
    %15 = vector.load %arg0[%c0_19, %c0_20] : memref<16x1xi32, #tpu.memory_space<vmem>>, vector<16x1xi32>
    %16 = vector.broadcast %15 : vector<16x1xi32> to vector<16x256xi32>
    %17 = arith.cmpi eq, %16, %14 : vector<16x256xi32>
    %18 = arith.extui %17 : vector<16x256xi1> to vector<16x256xi32>
    %19 = arith.sitofp %18 : vector<16x256xi32> to vector<16x256xf32>
    %c0_21 = arith.constant 0 : index
    %c0_22 = arith.constant 0 : index
    %20 = vector.load %arg1[%c0_21, %c0_22] : memref<256x96xf32, #tpu.memory_space<vmem>>, vector<256x96xf32>
    %cst = arith.constant dense<0.000000e+00> : vector<16x96xf32>
    %21 = tpu.matmul %19, %20, %cst {dimension_numbers = #tpu.dot_dimension_numbers<[1], [0], [0], [1], [0, 0, 1, 1], [], []>} : vector<16x256xf32>, vector<256x96xf32>, vector<16x96xf32> -> vector<16x96xf32>
    %22 = vector.broadcast %9 : vector<1x96xf32> to vector<16x96xf32>
    %23 = arith.addf %21, %22 : vector<16x96xf32>
    %c0_23 = arith.constant 0 : index
    %c0_24 = arith.constant 0 : index
    %c0_25 = arith.constant 0 : index
    %24 = vector.load %arg8[%c0_23, %c0_24, %c0_25] : memref<2x2x32xf32, #tpu.memory_space<vmem>>, vector<1x2x32xf32>
    %25 = vector.shape_cast %24 : vector<1x2x32xf32> to vector<2x32xf32>
    %c1_26 = arith.constant 1 : index
    %c0_27 = arith.constant 0 : index
    %c0_28 = arith.constant 0 : index
    %26 = vector.load %arg8[%c1_26, %c0_27, %c0_28] : memref<2x2x32xf32, #tpu.memory_space<vmem>>, vector<1x2x32xf32>
    %27 = vector.shape_cast %26 : vector<1x2x32xf32> to vector<2x32xf32>
    %28 = vector.extract_strided_slice %23 {offsets = [0, 0], sizes = [2, 96], strides = [1, 1]} : vector<16x96xf32> to vector<2x96xf32>
    %cst_29 = arith.constant dense<0.000000e+00> : vector<2x96xf32>
    %29 = tpu.matmul %25, %1, %cst_29 {dimension_numbers = #tpu.dot_dimension_numbers<[1], [0], [0], [1], [0, 0, 1, 1], [], []>} : vector<2x32xf32>, vector<32x96xf32>, vector<2x96xf32> -> vector<2x96xf32>
    %30 = arith.addf %28, %29 : vector<2x96xf32>
    %31 = vector.extract_strided_slice %30 {offsets = [0, 0], sizes = [2, 32], strides = [1, 1]} : vector<2x96xf32> to vector<2x32xf32>
    %32 = arith.negf %31 : vector<2x32xf32>
    %33 = math.exp %32 : vector<2x32xf32>
    %cst_30 = arith.constant 1.000000e+00 : f32
    %34 = vector.broadcast %cst_30 : f32 to vector<2x32xf32>
    %35 = arith.addf %34, %33 : vector<2x32xf32>
    %36 = arith.divf %34, %35 : vector<2x32xf32>
    %37 = vector.extract_strided_slice %30 {offsets = [0, 32], sizes = [2, 32], strides = [1, 1]} : vector<2x96xf32> to vector<2x32xf32>
    %38 = arith.negf %37 : vector<2x32xf32>
    %39 = math.exp %38 : vector<2x32xf32>
    %cst_31 = arith.constant 1.000000e+00 : f32
    %40 = vector.broadcast %cst_31 : f32 to vector<2x32xf32>
    %41 = arith.addf %40, %39 : vector<2x32xf32>
    %42 = arith.divf %40, %41 : vector<2x32xf32>
    %43 = vector.extract_strided_slice %28 {offsets = [0, 64], sizes = [2, 32], strides = [1, 1]} : vector<2x96xf32> to vector<2x32xf32>
    %44 = vector.extract_strided_slice %29 {offsets = [0, 64], sizes = [2, 32], strides = [1, 1]} : vector<2x96xf32> to vector<2x32xf32>
    %45 = vector.broadcast %5 : vector<1x32xf32> to vector<2x32xf32>
    %46 = arith.addf %44, %45 : vector<2x32xf32>
    %47 = arith.mulf %36, %46 : vector<2x32xf32>
    %48 = arith.addf %43, %47 : vector<2x32xf32>
    %49 = math.tanh %48 : vector<2x32xf32>
    %cst_32 = arith.constant 1.000000e+00 : f32
    %50 = vector.broadcast %cst_32 : f32 to vector<2x32xf32>
    %51 = arith.subf %50, %42 : vector<2x32xf32>
    %52 = arith.mulf %51, %49 : vector<2x32xf32>
    %53 = arith.mulf %42, %25 : vector<2x32xf32>
    %54 = arith.addf %52, %53 : vector<2x32xf32>
    %55 = vector.extract_strided_slice %23 {offsets = [2, 0], sizes = [2, 96], strides = [1, 1]} : vector<16x96xf32> to vector<2x96xf32>
    %cst_33 = arith.constant dense<0.000000e+00> : vector<2x96xf32>
    %56 = tpu.matmul %54, %1, %cst_33 {dimension_numbers = #tpu.dot_dimension_numbers<[1], [0], [0], [1], [0, 0, 1, 1], [], []>} : vector<2x32xf32>, vector<32x96xf32>, vector<2x96xf32> -> vector<2x96xf32>
    %57 = arith.addf %55, %56 : vector<2x96xf32>
    %58 = vector.extract_strided_slice %57 {offsets = [0, 0], sizes = [2, 32], strides = [1, 1]} : vector<2x96xf32> to vector<2x32xf32>
    %59 = arith.negf %58 : vector<2x32xf32>
    %60 = math.exp %59 : vector<2x32xf32>
    %cst_34 = arith.constant 1.000000e+00 : f32
    %61 = vector.broadcast %cst_34 : f32 to vector<2x32xf32>
    %62 = arith.addf %61, %60 : vector<2x32xf32>
    %63 = arith.divf %61, %62 : vector<2x32xf32>
    %64 = vector.extract_strided_slice %57 {offsets = [0, 32], sizes = [2, 32], strides = [1, 1]} : vector<2x96xf32> to vector<2x32xf32>
    %65 = arith.negf %64 : vector<2x32xf32>
    %66 = math.exp %65 : vector<2x32xf32>
    %cst_35 = arith.constant 1.000000e+00 : f32
    %67 = vector.broadcast %cst_35 : f32 to vector<2x32xf32>
    %68 = arith.addf %67, %66 : vector<2x32xf32>
    %69 = arith.divf %67, %68 : vector<2x32xf32>
    %70 = vector.extract_strided_slice %55 {offsets = [0, 64], sizes = [2, 32], strides = [1, 1]} : vector<2x96xf32> to vector<2x32xf32>
    %71 = vector.extract_strided_slice %56 {offsets = [0, 64], sizes = [2, 32], strides = [1, 1]} : vector<2x96xf32> to vector<2x32xf32>
    %72 = vector.broadcast %5 : vector<1x32xf32> to vector<2x32xf32>
    %73 = arith.addf %71, %72 : vector<2x32xf32>
    %74 = arith.mulf %63, %73 : vector<2x32xf32>
    %75 = arith.addf %70, %74 : vector<2x32xf32>
    %76 = math.tanh %75 : vector<2x32xf32>
    %cst_36 = arith.constant 1.000000e+00 : f32
    %77 = vector.broadcast %cst_36 : f32 to vector<2x32xf32>
    %78 = arith.subf %77, %69 : vector<2x32xf32>
    %79 = arith.mulf %78, %76 : vector<2x32xf32>
    %80 = arith.mulf %69, %54 : vector<2x32xf32>
    %81 = arith.addf %79, %80 : vector<2x32xf32>
    %cst_37 = arith.constant dense<0.000000e+00> : vector<2x96xf32>
    %82 = tpu.matmul %54, %13, %cst_37 {dimension_numbers = #tpu.dot_dimension_numbers<[1], [0], [0], [1], [0, 0, 1, 1], [], []>} : vector<2x32xf32>, vector<32x96xf32>, vector<2x96xf32> -> vector<2x96xf32>
    %83 = vector.broadcast %11 : vector<1x96xf32> to vector<2x96xf32>
    %84 = arith.addf %82, %83 : vector<2x96xf32>
    %cst_38 = arith.constant dense<0.000000e+00> : vector<2x96xf32>
    %85 = tpu.matmul %27, %3, %cst_38 {dimension_numbers = #tpu.dot_dimension_numbers<[1], [0], [0], [1], [0, 0, 1, 1], [], []>} : vector<2x32xf32>, vector<32x96xf32>, vector<2x96xf32> -> vector<2x96xf32>
    %86 = arith.addf %84, %85 : vector<2x96xf32>
    %87 = vector.extract_strided_slice %86 {offsets = [0, 0], sizes = [2, 32], strides = [1, 1]} : vector<2x96xf32> to vector<2x32xf32>
    %88 = arith.negf %87 : vector<2x32xf32>
    %89 = math.exp %88 : vector<2x32xf32>
    %cst_39 = arith.constant 1.000000e+00 : f32
    %90 = vector.broadcast %cst_39 : f32 to vector<2x32xf32>
    %91 = arith.addf %90, %89 : vector<2x32xf32>
    %92 = arith.divf %90, %91 : vector<2x32xf32>
    %93 = vector.extract_strided_slice %86 {offsets = [0, 32], sizes = [2, 32], strides = [1, 1]} : vector<2x96xf32> to vector<2x32xf32>
    %94 = arith.negf %93 : vector<2x32xf32>
    %95 = math.exp %94 : vector<2x32xf32>
    %cst_40 = arith.constant 1.000000e+00 : f32
    %96 = vector.broadcast %cst_40 : f32 to vector<2x32xf32>
    %97 = arith.addf %96, %95 : vector<2x32xf32>
    %98 = arith.divf %96, %97 : vector<2x32xf32>
    %99 = vector.extract_strided_slice %84 {offsets = [0, 64], sizes = [2, 32], strides = [1, 1]} : vector<2x96xf32> to vector<2x32xf32>
    %100 = vector.extract_strided_slice %85 {offsets = [0, 64], sizes = [2, 32], strides = [1, 1]} : vector<2x96xf32> to vector<2x32xf32>
    %101 = vector.broadcast %7 : vector<1x32xf32> to vector<2x32xf32>
    %102 = arith.addf %100, %101 : vector<2x32xf32>
    %103 = arith.mulf %92, %102 : vector<2x32xf32>
    %104 = arith.addf %99, %103 : vector<2x32xf32>
    %105 = math.tanh %104 : vector<2x32xf32>
    %cst_41 = arith.constant 1.000000e+00 : f32
    %106 = vector.broadcast %cst_41 : f32 to vector<2x32xf32>
    %107 = arith.subf %106, %98 : vector<2x32xf32>
    %108 = arith.mulf %107, %105 : vector<2x32xf32>
    %109 = arith.mulf %98, %27 : vector<2x32xf32>
    %110 = arith.addf %108, %109 : vector<2x32xf32>
    %c0_42 = arith.constant 0 : index
    %c0_43 = arith.constant 0 : index
    %111 = vector.load %arg11[%c0_42, %c0_43] : memref<16x32xf32, #tpu.memory_space<vmem>>, vector<2x32xf32>
    tpu.vector_store %arg11[%c0_42, %c0_43], %110 {strides = array<i32>} : memref<16x32xf32, #tpu.memory_space<vmem>>, vector<2x32xf32>,
    %112 = vector.extract_strided_slice %23 {offsets = [4, 0], sizes = [2, 96], strides = [1, 1]} : vector<16x96xf32> to vector<2x96xf32>
    %cst_44 = arith.constant dense<0.000000e+00> : vector<2x96xf32>
    %113 = tpu.matmul %81, %1, %cst_44 {dimension_numbers = #tpu.dot_dimension_numbers<[1], [0], [0], [1], [0, 0, 1, 1], [], []>} : vector<2x32xf32>, vector<32x96xf32>, vector<2x96xf32> -> vector<2x96xf32>
    %114 = arith.addf %112, %113 : vector<2x96xf32>
    %115 = vector.extract_strided_slice %114 {offsets = [0, 0], sizes = [2, 32], strides = [1, 1]} : vector<2x96xf32> to vector<2x32xf32>
    %116 = arith.negf %115 : vector<2x32xf32>
    %117 = math.exp %116 : vector<2x32xf32>
    %cst_45 = arith.constant 1.000000e+00 : f32
    %118 = vector.broadcast %cst_45 : f32 to vector<2x32xf32>
    %119 = arith.addf %118, %117 : vector<2x32xf32>
    %120 = arith.divf %118, %119 : vector<2x32xf32>
    %121 = vector.extract_strided_slice %114 {offsets = [0, 32], sizes = [2, 32], strides = [1, 1]} : vector<2x96xf32> to vector<2x32xf32>
    %122 = arith.negf %121 : vector<2x32xf32>
    %123 = math.exp %122 : vector<2x32xf32>
    %cst_46 = arith.constant 1.000000e+00 : f32
    %124 = vector.broadcast %cst_46 : f32 to vector<2x32xf32>
    %125 = arith.addf %124, %123 : vector<2x32xf32>
    %126 = arith.divf %124, %125 : vector<2x32xf32>
    %127 = vector.extract_strided_slice %112 {offsets = [0, 64], sizes = [2, 32], strides = [1, 1]} : vector<2x96xf32> to vector<2x32xf32>
    %128 = vector.extract_strided_slice %113 {offsets = [0, 64], sizes = [2, 32], strides = [1, 1]} : vector<2x96xf32> to vector<2x32xf32>
    %129 = vector.broadcast %5 : vector<1x32xf32> to vector<2x32xf32>
    %130 = arith.addf %128, %129 : vector<2x32xf32>
    %131 = arith.mulf %120, %130 : vector<2x32xf32>
    %132 = arith.addf %127, %131 : vector<2x32xf32>
    %133 = math.tanh %132 : vector<2x32xf32>
    %cst_47 = arith.constant 1.000000e+00 : f32
    %134 = vector.broadcast %cst_47 : f32 to vector<2x32xf32>
    %135 = arith.subf %134, %126 : vector<2x32xf32>
    %136 = arith.mulf %135, %133 : vector<2x32xf32>
    %137 = arith.mulf %126, %81 : vector<2x32xf32>
    %138 = arith.addf %136, %137 : vector<2x32xf32>
    %cst_48 = arith.constant dense<0.000000e+00> : vector<2x96xf32>
    %139 = tpu.matmul %81, %13, %cst_48 {dimension_numbers = #tpu.dot_dimension_numbers<[1], [0], [0], [1], [0, 0, 1, 1], [], []>} : vector<2x32xf32>, vector<32x96xf32>, vector<2x96xf32> -> vector<2x96xf32>
    %140 = vector.broadcast %11 : vector<1x96xf32> to vector<2x96xf32>
    %141 = arith.addf %139, %140 : vector<2x96xf32>
    %cst_49 = arith.constant dense<0.000000e+00> : vector<2x96xf32>
    %142 = tpu.matmul %110, %3, %cst_49 {dimension_numbers = #tpu.dot_dimension_numbers<[1], [0], [0], [1], [0, 0, 1, 1], [], []>} : vector<2x32xf32>, vector<32x96xf32>, vector<2x96xf32> -> vector<2x96xf32>
    %143 = arith.addf %141, %142 : vector<2x96xf32>
    %144 = vector.extract_strided_slice %143 {offsets = [0, 0], sizes = [2, 32], strides = [1, 1]} : vector<2x96xf32> to vector<2x32xf32>
    %145 = arith.negf %144 : vector<2x32xf32>
    %146 = math.exp %145 : vector<2x32xf32>
    %cst_50 = arith.constant 1.000000e+00 : f32
    %147 = vector.broadcast %cst_50 : f32 to vector<2x32xf32>
    %148 = arith.addf %147, %146 : vector<2x32xf32>
    %149 = arith.divf %147, %148 : vector<2x32xf32>
    %150 = vector.extract_strided_slice %143 {offsets = [0, 32], sizes = [2, 32], strides = [1, 1]} : vector<2x96xf32> to vector<2x32xf32>
    %151 = arith.negf %150 : vector<2x32xf32>
    %152 = math.exp %151 : vector<2x32xf32>
    %cst_51 = arith.constant 1.000000e+00 : f32
    %153 = vector.broadcast %cst_51 : f32 to vector<2x32xf32>
    %154 = arith.addf %153, %152 : vector<2x32xf32>
    %155 = arith.divf %153, %154 : vector<2x32xf32>
    %156 = vector.extract_strided_slice %141 {offsets = [0, 64], sizes = [2, 32], strides = [1, 1]} : vector<2x96xf32> to vector<2x32xf32>
    %157 = vector.extract_strided_slice %142 {offsets = [0, 64], sizes = [2, 32], strides = [1, 1]} : vector<2x96xf32> to vector<2x32xf32>
    %158 = vector.broadcast %7 : vector<1x32xf32> to vector<2x32xf32>
    %159 = arith.addf %157, %158 : vector<2x32xf32>
    %160 = arith.mulf %149, %159 : vector<2x32xf32>
    %161 = arith.addf %156, %160 : vector<2x32xf32>
    %162 = math.tanh %161 : vector<2x32xf32>
    %cst_52 = arith.constant 1.000000e+00 : f32
    %163 = vector.broadcast %cst_52 : f32 to vector<2x32xf32>
    %164 = arith.subf %163, %155 : vector<2x32xf32>
    %165 = arith.mulf %164, %162 : vector<2x32xf32>
    %166 = arith.mulf %155, %110 : vector<2x32xf32>
    %167 = arith.addf %165, %166 : vector<2x32xf32>
    %c2 = arith.constant 2 : index
    %c0_53 = arith.constant 0 : index
    %168 = vector.load %arg11[%c2, %c0_53] : memref<16x32xf32, #tpu.memory_space<vmem>>, vector<2x32xf32>
    tpu.vector_store %arg11[%c2, %c0_53], %167 {strides = array<i32>} : memref<16x32xf32, #tpu.memory_space<vmem>>, vector<2x32xf32>,
    %169 = vector.extract_strided_slice %23 {offsets = [6, 0], sizes = [2, 96], strides = [1, 1]} : vector<16x96xf32> to vector<2x96xf32>
    %cst_54 = arith.constant dense<0.000000e+00> : vector<2x96xf32>
    %170 = tpu.matmul %138, %1, %cst_54 {dimension_numbers = #tpu.dot_dimension_numbers<[1], [0], [0], [1], [0, 0, 1, 1], [], []>} : vector<2x32xf32>, vector<32x96xf32>, vector<2x96xf32> -> vector<2x96xf32>
    %171 = arith.addf %169, %170 : vector<2x96xf32>
    %172 = vector.extract_strided_slice %171 {offsets = [0, 0], sizes = [2, 32], strides = [1, 1]} : vector<2x96xf32> to vector<2x32xf32>
    %173 = arith.negf %172 : vector<2x32xf32>
    %174 = math.exp %173 : vector<2x32xf32>
    %cst_55 = arith.constant 1.000000e+00 : f32
    %175 = vector.broadcast %cst_55 : f32 to vector<2x32xf32>
    %176 = arith.addf %175, %174 : vector<2x32xf32>
    %177 = arith.divf %175, %176 : vector<2x32xf32>
    %178 = vector.extract_strided_slice %171 {offsets = [0, 32], sizes = [2, 32], strides = [1, 1]} : vector<2x96xf32> to vector<2x32xf32>
    %179 = arith.negf %178 : vector<2x32xf32>
    %180 = math.exp %179 : vector<2x32xf32>
    %cst_56 = arith.constant 1.000000e+00 : f32
    %181 = vector.broadcast %cst_56 : f32 to vector<2x32xf32>
    %182 = arith.addf %181, %180 : vector<2x32xf32>
    %183 = arith.divf %181, %182 : vector<2x32xf32>
    %184 = vector.extract_strided_slice %169 {offsets = [0, 64], sizes = [2, 32], strides = [1, 1]} : vector<2x96xf32> to vector<2x32xf32>
    %185 = vector.extract_strided_slice %170 {offsets = [0, 64], sizes = [2, 32], strides = [1, 1]} : vector<2x96xf32> to vector<2x32xf32>
    %186 = vector.broadcast %5 : vector<1x32xf32> to vector<2x32xf32>
    %187 = arith.addf %185, %186 : vector<2x32xf32>
    %188 = arith.mulf %177, %187 : vector<2x32xf32>
    %189 = arith.addf %184, %188 : vector<2x32xf32>
    %190 = math.tanh %189 : vector<2x32xf32>
    %cst_57 = arith.constant 1.000000e+00 : f32
    %191 = vector.broadcast %cst_57 : f32 to vector<2x32xf32>
    %192 = arith.subf %191, %183 : vector<2x32xf32>
    %193 = arith.mulf %192, %190 : vector<2x32xf32>
    %194 = arith.mulf %183, %138 : vector<2x32xf32>
    %195 = arith.addf %193, %194 : vector<2x32xf32>
    %cst_58 = arith.constant dense<0.000000e+00> : vector<2x96xf32>
    %196 = tpu.matmul %138, %13, %cst_58 {dimension_numbers = #tpu.dot_dimension_numbers<[1], [0], [0], [1], [0, 0, 1, 1], [], []>} : vector<2x32xf32>, vector<32x96xf32>, vector<2x96xf32> -> vector<2x96xf32>
    %197 = vector.broadcast %11 : vector<1x96xf32> to vector<2x96xf32>
    %198 = arith.addf %196, %197 : vector<2x96xf32>
    %cst_59 = arith.constant dense<0.000000e+00> : vector<2x96xf32>
    %199 = tpu.matmul %167, %3, %cst_59 {dimension_numbers = #tpu.dot_dimension_numbers<[1], [0], [0], [1], [0, 0, 1, 1], [], []>} : vector<2x32xf32>, vector<32x96xf32>, vector<2x96xf32> -> vector<2x96xf32>
    %200 = arith.addf %198, %199 : vector<2x96xf32>
    %201 = vector.extract_strided_slice %200 {offsets = [0, 0], sizes = [2, 32], strides = [1, 1]} : vector<2x96xf32> to vector<2x32xf32>
    %202 = arith.negf %201 : vector<2x32xf32>
    %203 = math.exp %202 : vector<2x32xf32>
    %cst_60 = arith.constant 1.000000e+00 : f32
    %204 = vector.broadcast %cst_60 : f32 to vector<2x32xf32>
    %205 = arith.addf %204, %203 : vector<2x32xf32>
    %206 = arith.divf %204, %205 : vector<2x32xf32>
    %207 = vector.extract_strided_slice %200 {offsets = [0, 32], sizes = [2, 32], strides = [1, 1]} : vector<2x96xf32> to vector<2x32xf32>
    %208 = arith.negf %207 : vector<2x32xf32>
    %209 = math.exp %208 : vector<2x32xf32>
    %cst_61 = arith.constant 1.000000e+00 : f32
    %210 = vector.broadcast %cst_61 : f32 to vector<2x32xf32>
    %211 = arith.addf %210, %209 : vector<2x32xf32>
    %212 = arith.divf %210, %211 : vector<2x32xf32>
    %213 = vector.extract_strided_slice %198 {offsets = [0, 64], sizes = [2, 32], strides = [1, 1]} : vector<2x96xf32> to vector<2x32xf32>
    %214 = vector.extract_strided_slice %199 {offsets = [0, 64], sizes = [2, 32], strides = [1, 1]} : vector<2x96xf32> to vector<2x32xf32>
    %215 = vector.broadcast %7 : vector<1x32xf32> to vector<2x32xf32>
    %216 = arith.addf %214, %215 : vector<2x32xf32>
    %217 = arith.mulf %206, %216 : vector<2x32xf32>
    %218 = arith.addf %213, %217 : vector<2x32xf32>
    %219 = math.tanh %218 : vector<2x32xf32>
    %cst_62 = arith.constant 1.000000e+00 : f32
    %220 = vector.broadcast %cst_62 : f32 to vector<2x32xf32>
    %221 = arith.subf %220, %212 : vector<2x32xf32>
    %222 = arith.mulf %221, %219 : vector<2x32xf32>
    %223 = arith.mulf %212, %167 : vector<2x32xf32>
    %224 = arith.addf %222, %223 : vector<2x32xf32>
    %c4 = arith.constant 4 : index
    %c0_63 = arith.constant 0 : index
    %225 = vector.load %arg11[%c4, %c0_63] : memref<16x32xf32, #tpu.memory_space<vmem>>, vector<2x32xf32>
    tpu.vector_store %arg11[%c4, %c0_63], %224 {strides = array<i32>} : memref<16x32xf32, #tpu.memory_space<vmem>>, vector<2x32xf32>,
    %226 = vector.extract_strided_slice %23 {offsets = [8, 0], sizes = [2, 96], strides = [1, 1]} : vector<16x96xf32> to vector<2x96xf32>
    %cst_64 = arith.constant dense<0.000000e+00> : vector<2x96xf32>
    %227 = tpu.matmul %195, %1, %cst_64 {dimension_numbers = #tpu.dot_dimension_numbers<[1], [0], [0], [1], [0, 0, 1, 1], [], []>} : vector<2x32xf32>, vector<32x96xf32>, vector<2x96xf32> -> vector<2x96xf32>
    %228 = arith.addf %226, %227 : vector<2x96xf32>
    %229 = vector.extract_strided_slice %228 {offsets = [0, 0], sizes = [2, 32], strides = [1, 1]} : vector<2x96xf32> to vector<2x32xf32>
    %230 = arith.negf %229 : vector<2x32xf32>
    %231 = math.exp %230 : vector<2x32xf32>
    %cst_65 = arith.constant 1.000000e+00 : f32
    %232 = vector.broadcast %cst_65 : f32 to vector<2x32xf32>
    %233 = arith.addf %232, %231 : vector<2x32xf32>
    %234 = arith.divf %232, %233 : vector<2x32xf32>
    %235 = vector.extract_strided_slice %228 {offsets = [0, 32], sizes = [2, 32], strides = [1, 1]} : vector<2x96xf32> to vector<2x32xf32>
    %236 = arith.negf %235 : vector<2x32xf32>
    %237 = math.exp %236 : vector<2x32xf32>
    %cst_66 = arith.constant 1.000000e+00 : f32
    %238 = vector.broadcast %cst_66 : f32 to vector<2x32xf32>
    %239 = arith.addf %238, %237 : vector<2x32xf32>
    %240 = arith.divf %238, %239 : vector<2x32xf32>
    %241 = vector.extract_strided_slice %226 {offsets = [0, 64], sizes = [2, 32], strides = [1, 1]} : vector<2x96xf32> to vector<2x32xf32>
    %242 = vector.extract_strided_slice %227 {offsets = [0, 64], sizes = [2, 32], strides = [1, 1]} : vector<2x96xf32> to vector<2x32xf32>
    %243 = vector.broadcast %5 : vector<1x32xf32> to vector<2x32xf32>
    %244 = arith.addf %242, %243 : vector<2x32xf32>
    %245 = arith.mulf %234, %244 : vector<2x32xf32>
    %246 = arith.addf %241, %245 : vector<2x32xf32>
    %247 = math.tanh %246 : vector<2x32xf32>
    %cst_67 = arith.constant 1.000000e+00 : f32
    %248 = vector.broadcast %cst_67 : f32 to vector<2x32xf32>
    %249 = arith.subf %248, %240 : vector<2x32xf32>
    %250 = arith.mulf %249, %247 : vector<2x32xf32>
    %251 = arith.mulf %240, %195 : vector<2x32xf32>
    %252 = arith.addf %250, %251 : vector<2x32xf32>
    %cst_68 = arith.constant dense<0.000000e+00> : vector<2x96xf32>
    %253 = tpu.matmul %195, %13, %cst_68 {dimension_numbers = #tpu.dot_dimension_numbers<[1], [0], [0], [1], [0, 0, 1, 1], [], []>} : vector<2x32xf32>, vector<32x96xf32>, vector<2x96xf32> -> vector<2x96xf32>
    %254 = vector.broadcast %11 : vector<1x96xf32> to vector<2x96xf32>
    %255 = arith.addf %253, %254 : vector<2x96xf32>
    %cst_69 = arith.constant dense<0.000000e+00> : vector<2x96xf32>
    %256 = tpu.matmul %224, %3, %cst_69 {dimension_numbers = #tpu.dot_dimension_numbers<[1], [0], [0], [1], [0, 0, 1, 1], [], []>} : vector<2x32xf32>, vector<32x96xf32>, vector<2x96xf32> -> vector<2x96xf32>
    %257 = arith.addf %255, %256 : vector<2x96xf32>
    %258 = vector.extract_strided_slice %257 {offsets = [0, 0], sizes = [2, 32], strides = [1, 1]} : vector<2x96xf32> to vector<2x32xf32>
    %259 = arith.negf %258 : vector<2x32xf32>
    %260 = math.exp %259 : vector<2x32xf32>
    %cst_70 = arith.constant 1.000000e+00 : f32
    %261 = vector.broadcast %cst_70 : f32 to vector<2x32xf32>
    %262 = arith.addf %261, %260 : vector<2x32xf32>
    %263 = arith.divf %261, %262 : vector<2x32xf32>
    %264 = vector.extract_strided_slice %257 {offsets = [0, 32], sizes = [2, 32], strides = [1, 1]} : vector<2x96xf32> to vector<2x32xf32>
    %265 = arith.negf %264 : vector<2x32xf32>
    %266 = math.exp %265 : vector<2x32xf32>
    %cst_71 = arith.constant 1.000000e+00 : f32
    %267 = vector.broadcast %cst_71 : f32 to vector<2x32xf32>
    %268 = arith.addf %267, %266 : vector<2x32xf32>
    %269 = arith.divf %267, %268 : vector<2x32xf32>
    %270 = vector.extract_strided_slice %255 {offsets = [0, 64], sizes = [2, 32], strides = [1, 1]} : vector<2x96xf32> to vector<2x32xf32>
    %271 = vector.extract_strided_slice %256 {offsets = [0, 64], sizes = [2, 32], strides = [1, 1]} : vector<2x96xf32> to vector<2x32xf32>
    %272 = vector.broadcast %7 : vector<1x32xf32> to vector<2x32xf32>
    %273 = arith.addf %271, %272 : vector<2x32xf32>
    %274 = arith.mulf %263, %273 : vector<2x32xf32>
    %275 = arith.addf %270, %274 : vector<2x32xf32>
    %276 = math.tanh %275 : vector<2x32xf32>
    %cst_72 = arith.constant 1.000000e+00 : f32
    %277 = vector.broadcast %cst_72 : f32 to vector<2x32xf32>
    %278 = arith.subf %277, %269 : vector<2x32xf32>
    %279 = arith.mulf %278, %276 : vector<2x32xf32>
    %280 = arith.mulf %269, %224 : vector<2x32xf32>
    %281 = arith.addf %279, %280 : vector<2x32xf32>
    %c6 = arith.constant 6 : index
    %c0_73 = arith.constant 0 : index
    %282 = vector.load %arg11[%c6, %c0_73] : memref<16x32xf32, #tpu.memory_space<vmem>>, vector<2x32xf32>
    tpu.vector_store %arg11[%c6, %c0_73], %281 {strides = array<i32>} : memref<16x32xf32, #tpu.memory_space<vmem>>, vector<2x32xf32>,
    %283 = vector.extract_strided_slice %23 {offsets = [10, 0], sizes = [2, 96], strides = [1, 1]} : vector<16x96xf32> to vector<2x96xf32>
    %cst_74 = arith.constant dense<0.000000e+00> : vector<2x96xf32>
    %284 = tpu.matmul %252, %1, %cst_74 {dimension_numbers = #tpu.dot_dimension_numbers<[1], [0], [0], [1], [0, 0, 1, 1], [], []>} : vector<2x32xf32>, vector<32x96xf32>, vector<2x96xf32> -> vector<2x96xf32>
    %285 = arith.addf %283, %284 : vector<2x96xf32>
    %286 = vector.extract_strided_slice %285 {offsets = [0, 0], sizes = [2, 32], strides = [1, 1]} : vector<2x96xf32> to vector<2x32xf32>
    %287 = arith.negf %286 : vector<2x32xf32>
    %288 = math.exp %287 : vector<2x32xf32>
    %cst_75 = arith.constant 1.000000e+00 : f32
    %289 = vector.broadcast %cst_75 : f32 to vector<2x32xf32>
    %290 = arith.addf %289, %288 : vector<2x32xf32>
    %291 = arith.divf %289, %290 : vector<2x32xf32>
    %292 = vector.extract_strided_slice %285 {offsets = [0, 32], sizes = [2, 32], strides = [1, 1]} : vector<2x96xf32> to vector<2x32xf32>
    %293 = arith.negf %292 : vector<2x32xf32>
    %294 = math.exp %293 : vector<2x32xf32>
    %cst_76 = arith.constant 1.000000e+00 : f32
    %295 = vector.broadcast %cst_76 : f32 to vector<2x32xf32>
    %296 = arith.addf %295, %294 : vector<2x32xf32>
    %297 = arith.divf %295, %296 : vector<2x32xf32>
    %298 = vector.extract_strided_slice %283 {offsets = [0, 64], sizes = [2, 32], strides = [1, 1]} : vector<2x96xf32> to vector<2x32xf32>
    %299 = vector.extract_strided_slice %284 {offsets = [0, 64], sizes = [2, 32], strides = [1, 1]} : vector<2x96xf32> to vector<2x32xf32>
    %300 = vector.broadcast %5 : vector<1x32xf32> to vector<2x32xf32>
    %301 = arith.addf %299, %300 : vector<2x32xf32>
    %302 = arith.mulf %291, %301 : vector<2x32xf32>
    %303 = arith.addf %298, %302 : vector<2x32xf32>
    %304 = math.tanh %303 : vector<2x32xf32>
    %cst_77 = arith.constant 1.000000e+00 : f32
    %305 = vector.broadcast %cst_77 : f32 to vector<2x32xf32>
    %306 = arith.subf %305, %297 : vector<2x32xf32>
    %307 = arith.mulf %306, %304 : vector<2x32xf32>
    %308 = arith.mulf %297, %252 : vector<2x32xf32>
    %309 = arith.addf %307, %308 : vector<2x32xf32>
    %cst_78 = arith.constant dense<0.000000e+00> : vector<2x96xf32>
    %310 = tpu.matmul %252, %13, %cst_78 {dimension_numbers = #tpu.dot_dimension_numbers<[1], [0], [0], [1], [0, 0, 1, 1], [], []>} : vector<2x32xf32>, vector<32x96xf32>, vector<2x96xf32> -> vector<2x96xf32>
    %311 = vector.broadcast %11 : vector<1x96xf32> to vector<2x96xf32>
    %312 = arith.addf %310, %311 : vector<2x96xf32>
    %cst_79 = arith.constant dense<0.000000e+00> : vector<2x96xf32>
    %313 = tpu.matmul %281, %3, %cst_79 {dimension_numbers = #tpu.dot_dimension_numbers<[1], [0], [0], [1], [0, 0, 1, 1], [], []>} : vector<2x32xf32>, vector<32x96xf32>, vector<2x96xf32> -> vector<2x96xf32>
    %314 = arith.addf %312, %313 : vector<2x96xf32>
    %315 = vector.extract_strided_slice %314 {offsets = [0, 0], sizes = [2, 32], strides = [1, 1]} : vector<2x96xf32> to vector<2x32xf32>
    %316 = arith.negf %315 : vector<2x32xf32>
    %317 = math.exp %316 : vector<2x32xf32>
    %cst_80 = arith.constant 1.000000e+00 : f32
    %318 = vector.broadcast %cst_80 : f32 to vector<2x32xf32>
    %319 = arith.addf %318, %317 : vector<2x32xf32>
    %320 = arith.divf %318, %319 : vector<2x32xf32>
    %321 = vector.extract_strided_slice %314 {offsets = [0, 32], sizes = [2, 32], strides = [1, 1]} : vector<2x96xf32> to vector<2x32xf32>
    %322 = arith.negf %321 : vector<2x32xf32>
    %323 = math.exp %322 : vector<2x32xf32>
    %cst_81 = arith.constant 1.000000e+00 : f32
    %324 = vector.broadcast %cst_81 : f32 to vector<2x32xf32>
    %325 = arith.addf %324, %323 : vector<2x32xf32>
    %326 = arith.divf %324, %325 : vector<2x32xf32>
    %327 = vector.extract_strided_slice %312 {offsets = [0, 64], sizes = [2, 32], strides = [1, 1]} : vector<2x96xf32> to vector<2x32xf32>
    %328 = vector.extract_strided_slice %313 {offsets = [0, 64], sizes = [2, 32], strides = [1, 1]} : vector<2x96xf32> to vector<2x32xf32>
    %329 = vector.broadcast %7 : vector<1x32xf32> to vector<2x32xf32>
    %330 = arith.addf %328, %329 : vector<2x32xf32>
    %331 = arith.mulf %320, %330 : vector<2x32xf32>
    %332 = arith.addf %327, %331 : vector<2x32xf32>
    %333 = math.tanh %332 : vector<2x32xf32>
    %cst_82 = arith.constant 1.000000e+00 : f32
    %334 = vector.broadcast %cst_82 : f32 to vector<2x32xf32>
    %335 = arith.subf %334, %326 : vector<2x32xf32>
    %336 = arith.mulf %335, %333 : vector<2x32xf32>
    %337 = arith.mulf %326, %281 : vector<2x32xf32>
    %338 = arith.addf %336, %337 : vector<2x32xf32>
    %c8 = arith.constant 8 : index
    %c0_83 = arith.constant 0 : index
    %339 = vector.load %arg11[%c8, %c0_83] : memref<16x32xf32, #tpu.memory_space<vmem>>, vector<2x32xf32>
    tpu.vector_store %arg11[%c8, %c0_83], %338 {strides = array<i32>} : memref<16x32xf32, #tpu.memory_space<vmem>>, vector<2x32xf32>,
    %340 = vector.extract_strided_slice %23 {offsets = [12, 0], sizes = [2, 96], strides = [1, 1]} : vector<16x96xf32> to vector<2x96xf32>
    %cst_84 = arith.constant dense<0.000000e+00> : vector<2x96xf32>
    %341 = tpu.matmul %309, %1, %cst_84 {dimension_numbers = #tpu.dot_dimension_numbers<[1], [0], [0], [1], [0, 0, 1, 1], [], []>} : vector<2x32xf32>, vector<32x96xf32>, vector<2x96xf32> -> vector<2x96xf32>
    %342 = arith.addf %340, %341 : vector<2x96xf32>
    %343 = vector.extract_strided_slice %342 {offsets = [0, 0], sizes = [2, 32], strides = [1, 1]} : vector<2x96xf32> to vector<2x32xf32>
    %344 = arith.negf %343 : vector<2x32xf32>
    %345 = math.exp %344 : vector<2x32xf32>
    %cst_85 = arith.constant 1.000000e+00 : f32
    %346 = vector.broadcast %cst_85 : f32 to vector<2x32xf32>
    %347 = arith.addf %346, %345 : vector<2x32xf32>
    %348 = arith.divf %346, %347 : vector<2x32xf32>
    %349 = vector.extract_strided_slice %342 {offsets = [0, 32], sizes = [2, 32], strides = [1, 1]} : vector<2x96xf32> to vector<2x32xf32>
    %350 = arith.negf %349 : vector<2x32xf32>
    %351 = math.exp %350 : vector<2x32xf32>
    %cst_86 = arith.constant 1.000000e+00 : f32
    %352 = vector.broadcast %cst_86 : f32 to vector<2x32xf32>
    %353 = arith.addf %352, %351 : vector<2x32xf32>
    %354 = arith.divf %352, %353 : vector<2x32xf32>
    %355 = vector.extract_strided_slice %340 {offsets = [0, 64], sizes = [2, 32], strides = [1, 1]} : vector<2x96xf32> to vector<2x32xf32>
    %356 = vector.extract_strided_slice %341 {offsets = [0, 64], sizes = [2, 32], strides = [1, 1]} : vector<2x96xf32> to vector<2x32xf32>
    %357 = vector.broadcast %5 : vector<1x32xf32> to vector<2x32xf32>
    %358 = arith.addf %356, %357 : vector<2x32xf32>
    %359 = arith.mulf %348, %358 : vector<2x32xf32>
    %360 = arith.addf %355, %359 : vector<2x32xf32>
    %361 = math.tanh %360 : vector<2x32xf32>
    %cst_87 = arith.constant 1.000000e+00 : f32
    %362 = vector.broadcast %cst_87 : f32 to vector<2x32xf32>
    %363 = arith.subf %362, %354 : vector<2x32xf32>
    %364 = arith.mulf %363, %361 : vector<2x32xf32>
    %365 = arith.mulf %354, %309 : vector<2x32xf32>
    %366 = arith.addf %364, %365 : vector<2x32xf32>
    %cst_88 = arith.constant dense<0.000000e+00> : vector<2x96xf32>
    %367 = tpu.matmul %309, %13, %cst_88 {dimension_numbers = #tpu.dot_dimension_numbers<[1], [0], [0], [1], [0, 0, 1, 1], [], []>} : vector<2x32xf32>, vector<32x96xf32>, vector<2x96xf32> -> vector<2x96xf32>
    %368 = vector.broadcast %11 : vector<1x96xf32> to vector<2x96xf32>
    %369 = arith.addf %367, %368 : vector<2x96xf32>
    %cst_89 = arith.constant dense<0.000000e+00> : vector<2x96xf32>
    %370 = tpu.matmul %338, %3, %cst_89 {dimension_numbers = #tpu.dot_dimension_numbers<[1], [0], [0], [1], [0, 0, 1, 1], [], []>} : vector<2x32xf32>, vector<32x96xf32>, vector<2x96xf32> -> vector<2x96xf32>
    %371 = arith.addf %369, %370 : vector<2x96xf32>
    %372 = vector.extract_strided_slice %371 {offsets = [0, 0], sizes = [2, 32], strides = [1, 1]} : vector<2x96xf32> to vector<2x32xf32>
    %373 = arith.negf %372 : vector<2x32xf32>
    %374 = math.exp %373 : vector<2x32xf32>
    %cst_90 = arith.constant 1.000000e+00 : f32
    %375 = vector.broadcast %cst_90 : f32 to vector<2x32xf32>
    %376 = arith.addf %375, %374 : vector<2x32xf32>
    %377 = arith.divf %375, %376 : vector<2x32xf32>
    %378 = vector.extract_strided_slice %371 {offsets = [0, 32], sizes = [2, 32], strides = [1, 1]} : vector<2x96xf32> to vector<2x32xf32>
    %379 = arith.negf %378 : vector<2x32xf32>
    %380 = math.exp %379 : vector<2x32xf32>
    %cst_91 = arith.constant 1.000000e+00 : f32
    %381 = vector.broadcast %cst_91 : f32 to vector<2x32xf32>
    %382 = arith.addf %381, %380 : vector<2x32xf32>
    %383 = arith.divf %381, %382 : vector<2x32xf32>
    %384 = vector.extract_strided_slice %369 {offsets = [0, 64], sizes = [2, 32], strides = [1, 1]} : vector<2x96xf32> to vector<2x32xf32>
    %385 = vector.extract_strided_slice %370 {offsets = [0, 64], sizes = [2, 32], strides = [1, 1]} : vector<2x96xf32> to vector<2x32xf32>
    %386 = vector.broadcast %7 : vector<1x32xf32> to vector<2x32xf32>
    %387 = arith.addf %385, %386 : vector<2x32xf32>
    %388 = arith.mulf %377, %387 : vector<2x32xf32>
    %389 = arith.addf %384, %388 : vector<2x32xf32>
    %390 = math.tanh %389 : vector<2x32xf32>
    %cst_92 = arith.constant 1.000000e+00 : f32
    %391 = vector.broadcast %cst_92 : f32 to vector<2x32xf32>
    %392 = arith.subf %391, %383 : vector<2x32xf32>
    %393 = arith.mulf %392, %390 : vector<2x32xf32>
    %394 = arith.mulf %383, %338 : vector<2x32xf32>
    %395 = arith.addf %393, %394 : vector<2x32xf32>
    %c10 = arith.constant 10 : index
    %c0_93 = arith.constant 0 : index
    %396 = vector.load %arg11[%c10, %c0_93] : memref<16x32xf32, #tpu.memory_space<vmem>>, vector<2x32xf32>
    tpu.vector_store %arg11[%c10, %c0_93], %395 {strides = array<i32>} : memref<16x32xf32, #tpu.memory_space<vmem>>, vector<2x32xf32>,
    %397 = vector.extract_strided_slice %23 {offsets = [14, 0], sizes = [2, 96], strides = [1, 1]} : vector<16x96xf32> to vector<2x96xf32>
    %cst_94 = arith.constant dense<0.000000e+00> : vector<2x96xf32>
    %398 = tpu.matmul %366, %1, %cst_94 {dimension_numbers = #tpu.dot_dimension_numbers<[1], [0], [0], [1], [0, 0, 1, 1], [], []>} : vector<2x32xf32>, vector<32x96xf32>, vector<2x96xf32> -> vector<2x96xf32>
    %399 = arith.addf %397, %398 : vector<2x96xf32>
    %400 = vector.extract_strided_slice %399 {offsets = [0, 0], sizes = [2, 32], strides = [1, 1]} : vector<2x96xf32> to vector<2x32xf32>
    %401 = arith.negf %400 : vector<2x32xf32>
    %402 = math.exp %401 : vector<2x32xf32>
    %cst_95 = arith.constant 1.000000e+00 : f32
    %403 = vector.broadcast %cst_95 : f32 to vector<2x32xf32>
    %404 = arith.addf %403, %402 : vector<2x32xf32>
    %405 = arith.divf %403, %404 : vector<2x32xf32>
    %406 = vector.extract_strided_slice %399 {offsets = [0, 32], sizes = [2, 32], strides = [1, 1]} : vector<2x96xf32> to vector<2x32xf32>
    %407 = arith.negf %406 : vector<2x32xf32>
    %408 = math.exp %407 : vector<2x32xf32>
    %cst_96 = arith.constant 1.000000e+00 : f32
    %409 = vector.broadcast %cst_96 : f32 to vector<2x32xf32>
    %410 = arith.addf %409, %408 : vector<2x32xf32>
    %411 = arith.divf %409, %410 : vector<2x32xf32>
    %412 = vector.extract_strided_slice %397 {offsets = [0, 64], sizes = [2, 32], strides = [1, 1]} : vector<2x96xf32> to vector<2x32xf32>
    %413 = vector.extract_strided_slice %398 {offsets = [0, 64], sizes = [2, 32], strides = [1, 1]} : vector<2x96xf32> to vector<2x32xf32>
    %414 = vector.broadcast %5 : vector<1x32xf32> to vector<2x32xf32>
    %415 = arith.addf %413, %414 : vector<2x32xf32>
    %416 = arith.mulf %405, %415 : vector<2x32xf32>
    %417 = arith.addf %412, %416 : vector<2x32xf32>
    %418 = math.tanh %417 : vector<2x32xf32>
    %cst_97 = arith.constant 1.000000e+00 : f32
    %419 = vector.broadcast %cst_97 : f32 to vector<2x32xf32>
    %420 = arith.subf %419, %411 : vector<2x32xf32>
    %421 = arith.mulf %420, %418 : vector<2x32xf32>
    %422 = arith.mulf %411, %366 : vector<2x32xf32>
    %423 = arith.addf %421, %422 : vector<2x32xf32>
    %cst_98 = arith.constant dense<0.000000e+00> : vector<2x96xf32>
    %424 = tpu.matmul %366, %13, %cst_98 {dimension_numbers = #tpu.dot_dimension_numbers<[1], [0], [0], [1], [0, 0, 1, 1], [], []>} : vector<2x32xf32>, vector<32x96xf32>, vector<2x96xf32> -> vector<2x96xf32>
    %425 = vector.broadcast %11 : vector<1x96xf32> to vector<2x96xf32>
    %426 = arith.addf %424, %425 : vector<2x96xf32>
    %cst_99 = arith.constant dense<0.000000e+00> : vector<2x96xf32>
    %427 = tpu.matmul %395, %3, %cst_99 {dimension_numbers = #tpu.dot_dimension_numbers<[1], [0], [0], [1], [0, 0, 1, 1], [], []>} : vector<2x32xf32>, vector<32x96xf32>, vector<2x96xf32> -> vector<2x96xf32>
    %428 = arith.addf %426, %427 : vector<2x96xf32>
    %429 = vector.extract_strided_slice %428 {offsets = [0, 0], sizes = [2, 32], strides = [1, 1]} : vector<2x96xf32> to vector<2x32xf32>
    %430 = arith.negf %429 : vector<2x32xf32>
    %431 = math.exp %430 : vector<2x32xf32>
    %cst_100 = arith.constant 1.000000e+00 : f32
    %432 = vector.broadcast %cst_100 : f32 to vector<2x32xf32>
    %433 = arith.addf %432, %431 : vector<2x32xf32>
    %434 = arith.divf %432, %433 : vector<2x32xf32>
    %435 = vector.extract_strided_slice %428 {offsets = [0, 32], sizes = [2, 32], strides = [1, 1]} : vector<2x96xf32> to vector<2x32xf32>
    %436 = arith.negf %435 : vector<2x32xf32>
    %437 = math.exp %436 : vector<2x32xf32>
    %cst_101 = arith.constant 1.000000e+00 : f32
    %438 = vector.broadcast %cst_101 : f32 to vector<2x32xf32>
    %439 = arith.addf %438, %437 : vector<2x32xf32>
    %440 = arith.divf %438, %439 : vector<2x32xf32>
    %441 = vector.extract_strided_slice %426 {offsets = [0, 64], sizes = [2, 32], strides = [1, 1]} : vector<2x96xf32> to vector<2x32xf32>
    %442 = vector.extract_strided_slice %427 {offsets = [0, 64], sizes = [2, 32], strides = [1, 1]} : vector<2x96xf32> to vector<2x32xf32>
    %443 = vector.broadcast %7 : vector<1x32xf32> to vector<2x32xf32>
    %444 = arith.addf %442, %443 : vector<2x32xf32>
    %445 = arith.mulf %434, %444 : vector<2x32xf32>
    %446 = arith.addf %441, %445 : vector<2x32xf32>
    %447 = math.tanh %446 : vector<2x32xf32>
    %cst_102 = arith.constant 1.000000e+00 : f32
    %448 = vector.broadcast %cst_102 : f32 to vector<2x32xf32>
    %449 = arith.subf %448, %440 : vector<2x32xf32>
    %450 = arith.mulf %449, %447 : vector<2x32xf32>
    %451 = arith.mulf %440, %395 : vector<2x32xf32>
    %452 = arith.addf %450, %451 : vector<2x32xf32>
    %c12 = arith.constant 12 : index
    %c0_103 = arith.constant 0 : index
    %453 = vector.load %arg11[%c12, %c0_103] : memref<16x32xf32, #tpu.memory_space<vmem>>, vector<2x32xf32>
    tpu.vector_store %arg11[%c12, %c0_103], %452 {strides = array<i32>} : memref<16x32xf32, #tpu.memory_space<vmem>>, vector<2x32xf32>,
    %cst_104 = arith.constant dense<0.000000e+00> : vector<2x96xf32>
    %454 = tpu.matmul %423, %13, %cst_104 {dimension_numbers = #tpu.dot_dimension_numbers<[1], [0], [0], [1], [0, 0, 1, 1], [], []>} : vector<2x32xf32>, vector<32x96xf32>, vector<2x96xf32> -> vector<2x96xf32>
    %455 = vector.broadcast %11 : vector<1x96xf32> to vector<2x96xf32>
    %456 = arith.addf %454, %455 : vector<2x96xf32>
    %cst_105 = arith.constant dense<0.000000e+00> : vector<2x96xf32>
    %457 = tpu.matmul %452, %3, %cst_105 {dimension_numbers = #tpu.dot_dimension_numbers<[1], [0], [0], [1], [0, 0, 1, 1], [], []>} : vector<2x32xf32>, vector<32x96xf32>, vector<2x96xf32> -> vector<2x96xf32>
    %458 = arith.addf %456, %457 : vector<2x96xf32>
    %459 = vector.extract_strided_slice %458 {offsets = [0, 0], sizes = [2, 32], strides = [1, 1]} : vector<2x96xf32> to vector<2x32xf32>
    %460 = arith.negf %459 : vector<2x32xf32>
    %461 = math.exp %460 : vector<2x32xf32>
    %cst_106 = arith.constant 1.000000e+00 : f32
    %462 = vector.broadcast %cst_106 : f32 to vector<2x32xf32>
    %463 = arith.addf %462, %461 : vector<2x32xf32>
    %464 = arith.divf %462, %463 : vector<2x32xf32>
    %465 = vector.extract_strided_slice %458 {offsets = [0, 32], sizes = [2, 32], strides = [1, 1]} : vector<2x96xf32> to vector<2x32xf32>
    %466 = arith.negf %465 : vector<2x32xf32>
    %467 = math.exp %466 : vector<2x32xf32>
    %cst_107 = arith.constant 1.000000e+00 : f32
    %468 = vector.broadcast %cst_107 : f32 to vector<2x32xf32>
    %469 = arith.addf %468, %467 : vector<2x32xf32>
    %470 = arith.divf %468, %469 : vector<2x32xf32>
    %471 = vector.extract_strided_slice %456 {offsets = [0, 64], sizes = [2, 32], strides = [1, 1]} : vector<2x96xf32> to vector<2x32xf32>
    %472 = vector.extract_strided_slice %457 {offsets = [0, 64], sizes = [2, 32], strides = [1, 1]} : vector<2x96xf32> to vector<2x32xf32>
    %473 = vector.broadcast %7 : vector<1x32xf32> to vector<2x32xf32>
    %474 = arith.addf %472, %473 : vector<2x32xf32>
    %475 = arith.mulf %464, %474 : vector<2x32xf32>
    %476 = arith.addf %471, %475 : vector<2x32xf32>
    %477 = math.tanh %476 : vector<2x32xf32>
    %cst_108 = arith.constant 1.000000e+00 : f32
    %478 = vector.broadcast %cst_108 : f32 to vector<2x32xf32>
    %479 = arith.subf %478, %470 : vector<2x32xf32>
    %480 = arith.mulf %479, %477 : vector<2x32xf32>
    %481 = arith.mulf %470, %452 : vector<2x32xf32>
    %482 = arith.addf %480, %481 : vector<2x32xf32>
    %c14 = arith.constant 14 : index
    %c0_109 = arith.constant 0 : index
    %483 = vector.load %arg11[%c14, %c0_109] : memref<16x32xf32, #tpu.memory_space<vmem>>, vector<2x32xf32>
    tpu.vector_store %arg11[%c14, %c0_109], %482 {strides = array<i32>} : memref<16x32xf32, #tpu.memory_space<vmem>>, vector<2x32xf32>,
    %c0_110 = arith.constant 0 : index
    %c0_111 = arith.constant 0 : index
    %484 = vector.load %arg11[%c0_110, %c0_111] : memref<16x32xf32, #tpu.memory_space<vmem>>, vector<16x32xf32>
    %c0_112 = arith.constant 0 : index
    %c0_113 = arith.constant 0 : index
    %485 = vector.load %arg6[%c0_112, %c0_113] : memref<32x256xf32, #tpu.memory_space<vmem>>, vector<32x256xf32>
    %cst_114 = arith.constant dense<0.000000e+00> : vector<16x256xf32>
    %486 = tpu.matmul %484, %485, %cst_114 {dimension_numbers = #tpu.dot_dimension_numbers<[1], [0], [0], [1], [0, 0, 1, 1], [], []>} : vector<16x32xf32>, vector<32x256xf32>, vector<16x256xf32> -> vector<16x256xf32>
    %c0_115 = arith.constant 0 : index
    %c0_116 = arith.constant 0 : index
    %487 = vector.load %arg7[%c0_115, %c0_116] : memref<1x256xf32, #tpu.memory_space<vmem>>, vector<1x256xf32>
    %488 = vector.broadcast %487 : vector<1x256xf32> to vector<16x256xf32>
    %489 = arith.addf %486, %488 : vector<16x256xf32>
    %c0_117 = arith.constant 0 : index
    %c0_118 = arith.constant 0 : index
    %490 = vector.load %arg9[%c0_117, %c0_118] : memref<16x256xf32, #tpu.memory_space<vmem>>, vector<16x256xf32>
    tpu.vector_store %arg9[%c0_117, %c0_118], %489 {strides = array<i32>} : memref<16x256xf32, #tpu.memory_space<vmem>>, vector<16x256xf32>,
    %c0_119 = arith.constant 0 : index
    %c0_120 = arith.constant 0 : index
    %c0_121 = arith.constant 0 : index
    %491 = vector.load %arg10[%c0_119, %c0_120, %c0_121] : memref<2x2x32xf32, #tpu.memory_space<vmem>>, vector<1x2x32xf32>
    %492 = vector.shape_cast %491 : vector<1x2x32xf32> to vector<2x32xf32>
    %493 = vector.shape_cast %423 : vector<2x32xf32> to vector<1x2x32xf32>
    tpu.vector_store %arg10[%c0_119, %c0_120, %c0_121], %493 {strides = array<i32>} : memref<2x2x32xf32, #tpu.memory_space<vmem>>, vector<1x2x32xf32>,
    %c1_122 = arith.constant 1 : index
    %c0_123 = arith.constant 0 : index
    %c0_124 = arith.constant 0 : index
    %494 = vector.load %arg10[%c1_122, %c0_123, %c0_124] : memref<2x2x32xf32, #tpu.memory_space<vmem>>, vector<1x2x32xf32>
    %495 = vector.shape_cast %494 : vector<1x2x32xf32> to vector<2x32xf32>
    %496 = vector.shape_cast %482 : vector<2x32xf32> to vector<1x2x32xf32>
    tpu.vector_store %arg10[%c1_122, %c0_123, %c0_124], %496 {strides = array<i32>} : memref<2x2x32xf32, #tpu.memory_space<vmem>>, vector<1x2x32xf32>,
    return
  }
}

</mosaic_0001>

<bundles_post_ra>
// kernel: tpu_custom_call.1
= control target key start
LH: loop header
LB: loop body
LE: loop exit
PB: predicated region body
PF: predicated region fallthrough
CT: control target
= control target key end

     0   :  { %16 = vsyncpa [#allocation4], 0  ;;  %v1790_v3 = vmov 0   ;;  %vm163_vm0 = vcmask 261120   ;;  %s1791_s27 = smov 64   ;;  %s2411_s0 = inlined_call_operand.vmem [shape: s32[16,1], index: 0, kind: input, shape index: {}]   ;;  %s2412_s1 = inlined_call_operand.vmem [shape: f32[256,96], index: 1, kind: input, shape index: {}]   ;;  %s2413_s2 = inlined_call_operand.vmem [shape: f32[2,32,96], index: 2, kind: input, shape index: {}]   ;;  %s2414_s3 = inlined_call_operand.vmem [shape: f32[2,32,96], index: 3, kind: input, shape index: {}]   ;;  %s2415_s4 = inlined_call_operand.vmem [shape: f32[2,1,96], index: 4, kind: input, shape index: {}]   ;;  %s2416_s5 = inlined_call_operand.vmem [shape: f32[2,1,32], index: 5, kind: input, shape index: {}]   ;;  %s2417_s6 = inlined_call_operand.vmem [shape: f32[32,256], index: 6, kind: input, shape index: {}]   ;;  %s2418_s7 = inlined_call_operand.vmem [shape: f32[1,256], index: 7, kind: input, shape index: {}]   ;;  %s2419_s8 = inlined_call_operand.vmem [shape: f32[2,2,32], index: 8, kind: input, shape index: {}]   ;;  %s2420_s9 = inlined_call_operand.hbm [shape: f32[16,256], index: 9, kind: output, shape index: {0}]   ;;  %s2421_s10 = inlined_call_operand.hbm [shape: f32[2,2,32], index: 10, kind: output, shape index: {1}]  }
   0x1   :  { %v59_v0 = vld [vmem:[%s2411_s0] sm:$0xff]  ;;  %v1861_v1 = vld [vmem:[%s2414_s3 + $0x18] sm:$0xff]  ;;  %v1866_v2 = vld [vmem:[%s2414_s3 + $0x10] sm:$0xff]  ;;  %1635 = vset.pattern.permute.xlu0 %v1790_v3  ;;  %1636 = vset.pattern.permute.xlu1 %v1790_v3 }
   0x2   :  { %179 = vmatpush.msra.mxu2 %v1861_v1  ;;  %62 = vperm.xlu0 %1635, %v59_v0   ;;  %v1872_v4 = vld [vmem:[%s2414_s3 + $0x8] sm:$0xff]  ;;  %v94_v5 = vld [vmem:[%s2412_s1 + $0x78] sm:$0xff]  ;;  %v93_v7 = vld [vmem:[%s2412_s1 + $0x70] sm:$0xff] }
   0x3   :  { %252 = vmatpush.msra.mxu3 %v1861_v1  ;;  %114 = vmatpush.msra.mxu0 %v94_v5  ;;  %v110_v6 = vld [vmem:[%s2412_s1 + $0xf8] sm:$0xff]  ;;  %v109_v8 = vld [vmem:[%s2412_s1 + $0xf0] sm:$0xff]  ;;  %v1891_v9 = vld [vmem:[%s2414_s3] sm:$0xff] }
   0x4   :  { %180 = vmatpush.msra.mxu2 %v1866_v2  ;;  %137 = vmatpush.msra.mxu1 %v110_v6  ;;  %v92_v10 = vld [vmem:[%s2412_s1 + $0x68] sm:$0xff]  ;;  %v1901_v11 = vld [vmem:[%s2419_s8] sm:$0x3]  ;;  %v90_v16 = vld [vmem:[%s2412_s1 + $0x58] sm:$0xff] }
   0x5   :  { %253 = vmatpush.msra.mxu3 %v1866_v2  ;;  %115 = vmatpush.msra.mxu0 %v93_v7  ;;  %v108_v12 = vld [vmem:[%s2412_s1 + $0xe8] sm:$0xff]  ;;  %v1637_v13 = vld [vmem:[%s2416_s5] ss:$0 sm:$0xff]  ;;  %v106_v17 = vld [vmem:[%s2412_s1 + $0xd8] sm:$0xff] }
   0x6   :  { %181 = vmatpush.msra.mxu2 %v1872_v4  ;;  %138 = vmatpush.msra.mxu1 %v109_v8  ;;  %v91_v14 = vld [vmem:[%s2412_s1 + $0x60] sm:$0xff]  ;;  %v89_v18 = vld [vmem:[%s2412_s1 + $0x50] sm:$0xff]  ;;  %v88_v20 = vld [vmem:[%s2412_s1 + $0x48] sm:$0xff] }
   0x7   :  { %254 = vmatpush.msra.mxu3 %v1872_v4  ;;  %116 = vmatpush.msra.mxu0 %v92_v10  ;;  %v107_v15 = vld [vmem:[%s2412_s1 + $0xe0] sm:$0xff]  ;;  %v105_v19 = vld [vmem:[%s2412_s1 + $0xd0] sm:$0xff]  ;;  %v104_v21 = vld [vmem:[%s2412_s1 + $0xc8] sm:$0xff] }
   0x8   :  { %182 = vmatpush.msra.mxu2 %v1891_v9  ;;  %139 = vmatpush.msra.mxu1 %v108_v12 }
   0x9   :  { %1581 = vmatmul.msk.f32.vlgmr.msra.gmra.mxu2 %vm163_vm0, %v1901_v11  ;;  %117 = vmatpush.msra.mxu0 %v91_v14 }
   0xa   :  { %255 = vmatpush.msra.mxu3 %v1891_v9  ;;  %209 = vrot.lane.b32.xlu0 %v1637_v13, %s1791_s27 }
   0xb   :  { %140 = vmatpush.msra.mxu1 %v107_v15  ;;  %118 = vmatpush.msra.mxu0 %v90_v16 }
   0xd   :  { %141 = vmatpush.msra.mxu1 %v106_v17  ;;  %119 = vmatpush.msra.mxu0 %v89_v18 }
   0xe   :  { %17 = vsyncpa [#allocation6], 0  ;;  %v87_v22 = vld [vmem:[%s2412_s1 + $0x40] sm:$0xff]  ;;  %v86_v24 = vld [vmem:[%s2412_s1 + $0x38] sm:$0xff]  ;;  %v56_v40 = vlaneseq  ;;  %v1792_v44 = vmov 1.0   ;;  %s1793_s15 = smov 96  }
   0xf   :  { %142 = vmatpush.msra.mxu1 %v105_v19  ;;  %120 = vmatpush.msra.mxu0 %v88_v20  ;;  %v103_v23 = vld [vmem:[%s2412_s1 + $0xc0] sm:$0xff]  ;;  %v102_v25 = vld [vmem:[%s2412_s1 + $0xb8] sm:$0xff]  ;;  %v85_v26 = vld [vmem:[%s2412_s1 + $0x30] sm:$0xff]  ;;  %s1794_s16 = smov 32   ;;  %vm404_vm15 = vcmask 254976   ;;  %s1796_s17 = smov 2  }
  0x10   :  { %v101_v27 = vld [vmem:[%s2412_s1 + $0xb0] sm:$0xff]  ;;  %v84_v28 = vld [vmem:[%s2412_s1 + $0x28] sm:$0xff]  ;;  %v83_v30 = vld [vmem:[%s2412_s1 + $0x20] sm:$0xff]  ;;  %v1997_v41 = vand.u32 127, %v56_v40  ;;  %s1532_s20 = sshll.u32 %s2420_s9, 4  ;;  %s1533_s20 = int_to_ptr.hbm [resolvable:$true] %s1532_s20 }
  0x11   :  { %143 = vmatpush.msra.mxu1 %v104_v21  ;;  %121 = vmatpush.msra.mxu0 %v87_v22  ;;  %v100_v29 = vld [vmem:[%s2412_s1 + $0xa8] sm:$0xff]  ;;  %v99_v31 = vld [vmem:[%s2412_s1 + $0xa0] sm:$0xff]  ;;  %v82_v32 = vld [vmem:[%s2412_s1 + $0x18] sm:$0xff] }
  0x12   :  { %v98_v33 = vld [vmem:[%s2412_s1 + $0x98] sm:$0xff]  ;;  %v81_v34 = vld [vmem:[%s2412_s1 + $0x10] sm:$0xff]  ;;  %v80_v36 = vld [vmem:[%s2412_s1 + $0x8] sm:$0xff]  ;;  %v2000_v42 = vadd.s32 128, %v1997_v41 }
  0x13   :  { %144 = vmatpush.msra.mxu1 %v103_v23  ;;  %122 = vmatpush.msra.mxu0 %v86_v24  ;;  %v97_v35 = vld [vmem:[%s2412_s1 + $0x90] sm:$0xff]  ;;  %v96_v37 = vld [vmem:[%s2412_s1 + $0x88] sm:$0xff]  ;;  %v79_v38 = vld [vmem:[%s2412_s1] sm:$0xff] }
  0x14   :  { %v95_v39 = vld [vmem:[%s2412_s1 + $0x80] sm:$0xff]  ;;  %v2027_v13 = vld [vmem:[%s2413_s2 + $0x38] sm:$0xff]  ;;  %v2032_v14 = vld [vmem:[%s2413_s2 + $0x30] sm:$0xff] }
  0x15   :  { %145 = vmatpush.msra.mxu1 %v102_v25  ;;  %123 = vmatpush.msra.mxu0 %v85_v26  ;;  %v2013_v48 = vld [vmem:[%s2415_s4] ss:$0 sm:$0xff]  ;;  %v2039_v15 = vld [vmem:[%s2413_s2 + $0x28] sm:$0xff]  ;;  %v2067_v22 = vld [vmem:[%s2414_s3 + $0x38] sm:$0xff] }
  0x16   :  { %321 = vmatpush.msrb.mxu2 %v2027_v13  ;;  %v2072_v23 = vld [vmem:[%s2414_s3 + $0x30] sm:$0xff]  ;;  %344 = vmatpush.msrb.mxu3 %v2067_v22  ;;  %v2079_v24 = vld [vmem:[%s2414_s3 + $0x28] sm:$0xff]  ;;  %v2086_v25 = vld [vmem:[%s2414_s3 + $0x20] sm:$0xff] }
  0x17   :  { %146 = vmatpush.msra.mxu1 %v101_v27  ;;  %124 = vmatpush.msra.mxu0 %v84_v28  ;;  %v1639_v26 = vld [vmem:[%s2416_s5 + $0x1] ss:$0 sm:$0xff]  ;;  %v2105_v28 = vld [vmem:[%s2419_s8 + $0x2] sm:$0x3]  ;;  %s1545_s8 = sshll.u32 %s2421_s10, 4  ;;  %s1798_s10 = smov 256   ;;  %s1546_s8 = int_to_ptr.hbm [resolvable:$true] %s1545_s8 }
  0x18   :  { %322 = vmatpush.msrb.mxu2 %v2032_v14  ;;  %345 = vmatpush.msrb.mxu3 %v2072_v23 }
  0x19   :  { %147 = vmatpush.msra.mxu1 %v100_v29  ;;  %125 = vmatpush.msra.mxu0 %v83_v30 }
  0x1a   :  { %323 = vmatpush.msrb.mxu2 %v2039_v15  ;;  %346 = vmatpush.msrb.mxu3 %v2079_v24 }
  0x1b   :  { %148 = vmatpush.msra.mxu1 %v99_v31  ;;  %126 = vmatpush.msra.mxu0 %v82_v32 }
  0x1c   :  { %347 = vmatpush.msrb.mxu3 %v2086_v25 }
  0x1d   :  { %149 = vmatpush.msra.mxu1 %v98_v33  ;;  %127 = vmatpush.msra.mxu0 %v81_v34 }
  0x1f   :  { %150 = vmatpush.msra.mxu1 %v97_v35  ;;  %128 = vmatpush.msra.mxu0 %v80_v36 }
  0x21   :  { %151 = vmatpush.msra.mxu1 %v96_v37  ;;  %129 = vmatpush.msra.mxu0 %v79_v38 }
  0x23   :  { %152 = vmatpush.msra.mxu1 %v95_v39  ;;  %742 = vmatpush.msrb.mxu0 %v1861_v1 }
  0x25   :  { %743 = vmatpush.msrb.mxu0 %v1866_v2  ;;  %803 = vmatpush.msrb.mxu1 %v2027_v13 }
  0x27   :  { %744 = vmatpush.msrb.mxu0 %v1872_v4  ;;  %804 = vmatpush.msrb.mxu1 %v2032_v14 }
  0x29   :  { %745 = vmatpush.msrb.mxu0 %v1891_v9  ;;  %805 = vmatpush.msrb.mxu1 %v2039_v15 }
  0x74   :  { %v63_v43 = vpop.permute.xlu0 %62 }
  0x75   :  { %vm67_vm1 = vcmp.eq.s32.totalorder %v63_v43, %v1997_v41  ;;  %vm68_vm2 = vcmp.eq.s32.totalorder %v63_v43, %v2000_v42 }
  0x76   :  { %1576 = vmatmul.msk.f32.vlgmr.msra.gmra.mxu0 %vm67_vm1, %v1792_v44  ;;  %1578 = vmatmul.msk.f32.vlgmr.msra.gmra.mxu1 %vm68_vm2, %v1792_v44 }
  0x77   :  { %961 = vmatpush.msra.mxu0 %v2027_v13 }
  0x79   :  { %962 = vmatpush.msra.mxu0 %v2032_v14 }
  0x7b   :  { %963 = vmatpush.msra.mxu0 %v2039_v15 }
  0x7c   :  { %v2006_v45 = vpop.permute.xlu0 %209 }
  0x8c   :  { %v184_v46 = vpop.f32.mrf.mxu2 }
  0x8d   :  { %v212_v47 = vadd.f32 %v2006_v45, %v184_v46 }
  0x8f   :  { %214 = vrot.lane.b32.xlu1 %v212_v47, %s1791_s27 }
  0xf3   :  { %v131_v49 = vpop.f32.mrf.mxu0  ;;  %v154_v51 = vpop.f32.mrf.mxu1 }
  0xf4   :  { %v132_v50 = vadd.f32 %v2013_v48, %v131_v49 }
  0xf6   :  { %v2016_v52 = vadd.f32 %v154_v51, %v132_v50 }
  0xf8   :  { %v187_v53 = vadd.f32 %v184_v46, %v2016_v52 }
  0xfa   :  { %v1582_v54 = vmul.f32 -1.442695, %v187_v53 }
  0xfc   :  { %1641 = vpow2.f32 %v1582_v54 }
 0x101   :  { %v215_v0 = vpop.permute.xlu1 %214 }
 0x102   :  { %v1642_v55 = vpop.eup %1641 }
 0x103   :  { %v191_v56 = vadd.f32 1.0, %v1642_v55 }
 0x105   :  { %1643 = vrcp.f32 %v191_v56  ;;  %v203_v60 = vand.u32 2147483648, %v191_v56  ;;  %v201_v62 = vand.u32 2147483647, %v191_v56  ;;  %vm197_vm4 = vweird.f32 %v191_v56 }
 0x107   :  { %v204_v3 = vor.u32 1.1754944e-38, %v203_v60  ;;  %vm202_vm6 = vcmp.eq.f32.partialorder %v201_v62, 8.507059e+37 }
 0x10b   :  { %v1644_v57 = vpop.eup %1643 }
 0x10c   :  { %v193_v58 = vmul.f32 %v1644_v57, %v191_v56  ;;  %vm198_vm3 = vweird.f32 %v1644_v57 }
 0x10d   :  { %vm199_vm5 = vmor %vm197_vm4, %vm198_vm3 }
 0x10e   :  { %v194_v59 = vsub.f32 1.0, %v193_v58  ;;  %v2128_v58 = vld [vmem:[%s2415_s4 + $0x1] ss:$0 sm:$0xff] }
 0x110   :  { %v195_v61 = vmul.f32 %v1644_v57, %v194_v59 }
 0x112   :  { %v196_v63 = vadd.f32 %v1644_v57, %v195_v61 }
 0x114   :  { %v200_v5 = vsel %vm199_vm5, %v1644_v57, %v196_v63 }
 0x115   :  { %v205_v6 = vsel %vm202_vm6, %v204_v3, %v200_v5 }
 0x116   :  { %v217_v7 = vmul.f32 %v215_v0, %v205_v6  ;;  %v224_v17 = vsub.f32 1.0, %v205_v6 }
 0x118   :  { %219 = vrot.lane.b32.xlu1 %v217_v7, %s1791_s27 }
 0x120   :  { %374 = vrot.lane.b32.xlu1 %v1639_v26, %s1791_s27 }
 0x18a   :  { %v220_v8 = vpop.permute.xlu1 %219 }
 0x18b   :  { %v222_v10 = vadd.f32 %v220_v8, %v2016_v52 }
 0x18d   :  { %1645 = vtanh.f32 %v222_v10 }
 0x192   :  { %v2120_v35 = vpop.permute.xlu1 %374 }
 0x193   :  { %v1646_v12 = vpop.eup %1645 }
 0x194   :  { %226 = vrot.lane.b32.xlu2 %v1646_v12, %s1793_s15 }
 0x19c   :  { %230 = vrot.lane.b32.xlu2 %v1901_v11, %s1794_s16  ;;  %v2047_v11 = vld [vmem:[%s2413_s2 + $0x20] sm:$0xff] }
 0x19d   :  { %324 = vmatpush.msrb.mxu2 %v2047_v11  ;;  %806 = vmatpush.msrb.mxu1 %v2047_v11 }
 0x19e   :  { %964 = vmatpush.msra.mxu0 %v2047_v11 }
 0x19f   :  { %424 = vmatpush.msra.mxu2 %v1861_v1  ;;  %983 = vmatpush.msra.mxu1 %v2067_v22 }
 0x1a1   :  { %425 = vmatpush.msra.mxu2 %v1866_v2  ;;  %984 = vmatpush.msra.mxu1 %v2072_v23 }
 0x1a3   :  { %426 = vmatpush.msra.mxu2 %v1872_v4  ;;  %985 = vmatpush.msra.mxu1 %v2079_v24 }
 0x1a5   :  { %427 = vmatpush.msra.mxu2 %v1891_v9  ;;  %986 = vmatpush.msra.mxu1 %v2086_v25 }
 0x1ee   :  { %v227_v16 = vpop.permute.xlu2 %226 }
 0x1ef   :  { %v229_v19 = vmul.f32 %v227_v16, %v224_v17 }
 0x1f6   :  { %v231_v18 = vpop.permute.xlu2 %230 }
 0x1f7   :  { %v233_v20 = vmul.f32 %v231_v18, %v205_v6 }
 0x1f9   :  { %v2060_v21 = vadd.f32 %v233_v20, %v229_v19 }
 0x1fb   :  { %236 = vrot.lane.b32.xlu0 %v2060_v21, %s1793_s15  ;;  %v302_v54 = vrot.slane %v2060_v21, 6 }
 0x26d   :  { %v237_v27 = vpop.permute.xlu0 %236 }
 0x26e   :  { %1583 = vmatmul.msk.f32.vlgmr.msra.gmra.mxu3 %vm163_vm0, %v237_v27  ;;  %1585 = vmatmul.msk.f32.vlgmr.msrb.gmra.mxu2 %vm163_vm0, %v237_v27 }
 0x26f   :  { %490 = vmatpush.msra.mxu3 %v2027_v13  ;;  %512 = vmatpush.msrb.mxu2 %v2067_v22 }
 0x271   :  { %491 = vmatpush.msra.mxu3 %v2032_v14  ;;  %513 = vmatpush.msrb.mxu2 %v2072_v23 }
 0x273   :  { %492 = vmatpush.msra.mxu3 %v2039_v15  ;;  %514 = vmatpush.msrb.mxu2 %v2079_v24 }
 0x275   :  { %493 = vmatpush.msra.mxu3 %v2047_v11  ;;  %515 = vmatpush.msrb.mxu2 %v2086_v25 }
 0x276   :  { %1586 = vmatmul.msk.f32.vlgmr.msrb.gmra.mxu3 %vm163_vm0, %v2105_v28 }
 0x277   :  { %583 = vmatpush.msrb.mxu3 %v1861_v1 }
 0x279   :  { %584 = vmatpush.msrb.mxu3 %v1866_v2 }
 0x27b   :  { %585 = vmatpush.msrb.mxu3 %v1872_v4 }
 0x27d   :  { %586 = vmatpush.msrb.mxu3 %v1891_v9 }
 0x2f1   :  { %v257_v29 = vpop.f32.mrf.mxu3  ;;  %v326_v59 = vpop.f32.mrf.mxu2 }
 0x2f2   :  { %v261_v30 = vrot.slane %v257_v29, 6  ;;  %v283_v31 = vadd.f32 %v257_v29, %v2006_v45  ;;  %v327_v60 = vadd.f32 %v2128_v58, %v326_v59 }
 0x2f4   :  { %v263_v32 = vadd.f32 %v261_v30, %v2016_v52  ;;  %v285_v33 = vrot.slane %v283_v31, 6 }
 0x2f6   :  { %v1584_v34 = vmul.f32 -1.442695, %v263_v32  ;;  %286 = vrot.lane.b32.xlu2 %v285_v33, %s1791_s27 }
 0x2f8   :  { %1647 = vpow2.f32 %v1584_v34 }
 0x2f9   :  { %v349_v36 = vpop.f32.mrf.mxu3 }
 0x2fa   :  { %v377_v37 = vadd.f32 %v2120_v35, %v349_v36  ;;  %v352_v61 = vadd.f32 %v349_v36, %v327_v60 }
 0x2fc   :  { %379 = vrot.lane.b32.xlu0 %v377_v37, %s1791_s27  ;;  %v1587_v62 = vmul.f32 -1.442695, %v352_v61 }
 0x2fe   :  { %v1648_v38 = vpop.eup %1647 }
 0x2ff   :  { %v267_v39 = vadd.f32 1.0, %v1648_v38 }
 0x301   :  { %1649 = vrcp.f32 %v267_v39  ;;  %v279_v47 = vand.u32 2147483648, %v267_v39  ;;  %v277_v50 = vand.u32 2147483647, %v267_v39  ;;  %vm273_vm8 = vweird.f32 %v267_v39 }
 0x302   :  { %1651 = vpow2.f32 %v1587_v62 }
 0x303   :  { %v280_v53 = vor.u32 1.1754944e-38, %v279_v47  ;;  %vm278_vm10 = vcmp.eq.f32.partialorder %v277_v50, 8.507059e+37 }
 0x307   :  { %v1650_v40 = vpop.eup %1649 }
 0x308   :  { %v269_v43 = vmul.f32 %v1650_v40, %v267_v39  ;;  %vm274_vm7 = vweird.f32 %v1650_v40  ;;  %v1652_v63 = vpop.eup %1651 }
 0x309   :  { %vm275_vm9 = vmor %vm273_vm8, %vm274_vm7  ;;  %v356_v0 = vadd.f32 1.0, %v1652_v63 }
 0x30a   :  { %v270_v46 = vsub.f32 1.0, %v269_v43 }
 0x30b   :  { %1653 = vrcp.f32 %v356_v0  ;;  %v368_v16 = vand.u32 2147483648, %v356_v0  ;;  %vm362_vm12 = vweird.f32 %v356_v0  ;;  %v366_v17 = vand.u32 2147483647, %v356_v0 }
 0x30c   :  { %v271_v49 = vmul.f32 %v1650_v40, %v270_v46 }
 0x30d   :  { %v369_v19 = vor.u32 1.1754944e-38, %v368_v16  ;;  %vm367_vm14 = vcmp.eq.f32.partialorder %v366_v17, 8.507059e+37 }
 0x30e   :  { %v272_v51 = vadd.f32 %v1650_v40, %v271_v49 }
 0x310   :  { %v276_v55 = vsel %vm275_vm9, %v1650_v40, %v272_v51 }
 0x311   :  { %v281_v56 = vsel %vm278_vm10, %v280_v53, %v276_v55  ;;  %v1654_v6 = vpop.eup %1653 }
 0x312   :  { %v304_v57 = vmul.f32 %v302_v54, %v281_v56  ;;  %v358_v7 = vmul.f32 %v1654_v6, %v356_v0  ;;  %vm363_vm11 = vweird.f32 %v1654_v6  ;;  %v296_v34 = vsub.f32 1.0, %v281_v56 }
 0x313   :  { %vm364_vm13 = vmor %vm362_vm12, %vm363_vm11 }
 0x314   :  { %v359_v8 = vsub.f32 1.0, %v358_v7 }
 0x316   :  { %v360_v10 = vmul.f32 %v1654_v6, %v359_v8 }
 0x318   :  { %v361_v12 = vadd.f32 %v1654_v6, %v360_v10 }
 0x31a   :  { %v365_v18 = vsel %vm364_vm13, %v1654_v6, %v361_v12 }
 0x31b   :  { %v370_v20 = vsel %vm367_vm14, %v369_v19, %v365_v18 }
 0x31c   :  { %v389_v40 = vsub.f32 1.0, %v370_v20 }
 0x350   :  { %v287_v3 = vpop.permute.xlu2 %286 }
 0x351   :  { %v289_v5 = vmul.f32 %v287_v3, %v281_v56 }
 0x353   :  { %291 = vrot.lane.b32.xlu1 %v289_v5, %s1791_s27 }
 0x36e   :  { %v380_v21 = vpop.permute.xlu0 %379 }
 0x36f   :  { %v382_v26 = vmul.f32 %v380_v21, %v370_v20 }
 0x371   :  { %384 = vrot.lane.b32.xlu2 %v382_v26, %s1791_s27 }
 0x379   :  { %395 = vrot.lane.b32.xlu2 %v2105_v28, %s1794_s16 }
 0x3c5   :  { %v292_v27 = vpop.permute.xlu1 %291 }
 0x3c6   :  { %v294_v29 = vadd.f32 %v292_v27, %v2016_v52 }
 0x3c8   :  { %1655 = vtanh.f32 %v294_v29 }
 0x3cb   :  { %v385_v30 = vpop.permute.xlu2 %384 }
 0x3cc   :  { %v387_v31 = vadd.f32 %v385_v30, %v327_v60 }
 0x3ce   :  { %v1656_v32 = vpop.eup %1655  ;;  %1657 = vtanh.f32 %v387_v31 }
 0x3cf   :  { %298 = vrot.lane.b32.xlu0 %v1656_v32, %s1793_s15 }
 0x3d3   :  { %v396_v39 = vpop.permute.xlu2 %395 }
 0x3d4   :  { %v1658_v33 = vpop.eup %1657  ;;  %v398_v46 = vmul.f32 %v396_v39, %v370_v20 }
 0x3d5   :  { %391 = vrot.lane.b32.xlu1 %v1658_v33, %s1793_s15 }
 0x441   :  { %v299_v36 = vpop.permute.xlu0 %298 }
 0x442   :  { %v301_v37 = vmul.f32 %v299_v36, %v296_v34 }
 0x444   :  { %v305_v38 = vadd.f32 %v304_v57, %v301_v37 }
 0x446   :  { %v407_v28 = vrot.slane %v305_v38, 2  ;;  %v474_v16 = vrot.slane %v305_v38, 6 }
 0x447   :  { %v392_v43 = vpop.permute.xlu1 %391 }
 0x448   :  { %v394_v47 = vmul.f32 %v392_v43, %v389_v40  ;;  %408 = vrot.lane.b32.xlu0 %v407_v28, %s1793_s15 }
 0x44a   :  { %v2139_v49 = vadd.f32 %v398_v46, %v394_v47 }
 0x44c   :  { %401 = vrot.lane.b32.xlu1 %v2139_v49, %s1793_s15 }
 0x4ba   :  { %v409_v50 = vpop.permute.xlu0 %408 }
 0x4bb   :  { %1588 = vmatmul.msk.f32.vlgmr.msra.gmra.mxu2 %vm163_vm0, %v409_v50  ;;  %1590 = vmatmul.msk.f32.vlgmr.msra.gmra.mxu3 %vm163_vm0, %v409_v50 }
 0x4bc   :  { %649 = vmatpush.msra.mxu2 %v2027_v13  ;;  %671 = vmatpush.msra.mxu3 %v2067_v22 }
 0x4be   :  { %v402_v51 = vpop.permute.xlu1 %401  ;;  %650 = vmatpush.msra.mxu2 %v2032_v14  ;;  %672 = vmatpush.msra.mxu3 %v2072_v23 }
 0x4bf   :  { %405 = vst.msk [vmem:[#allocation2] sm:$0x3] %vm404_vm15, %v402_v51 }
 0x4c0   :  { %651 = vmatpush.msra.mxu2 %v2039_v15  ;;  %673 = vmatpush.msra.mxu3 %v2079_v24 }
 0x4c2   :  { %652 = vmatpush.msra.mxu2 %v2047_v11  ;;  %674 = vmatpush.msra.mxu3 %v2086_v25 }
 0x4c3   :  { %1591 = vmatmul.msk.f32.vlgmr.msrb.gmra.mxu2 %vm163_vm0, %v402_v51 }
 0x4c4   :  { %825 = vmatpush.msrb.mxu2 %v2067_v22 }
 0x4c6   :  { %826 = vmatpush.msrb.mxu2 %v2072_v23 }
 0x4c8   :  { %827 = vmatpush.msrb.mxu2 %v2079_v24 }
 0x4ca   :  { %828 = vmatpush.msrb.mxu2 %v2086_v25 }
 0x53e   :  { %v429_v53 = vpop.f32.mrf.mxu2  ;;  %v495_v20 = vpop.f32.mrf.mxu3 }
 0x53f   :  { %v433_v54 = vrot.slane %v429_v53, 4  ;;  %v455_v55 = vadd.f32 %v429_v53, %v2006_v45  ;;  %v496_v21 = vadd.f32 %v2128_v58, %v495_v20 }
 0x541   :  { %v435_v56 = vadd.f32 %v433_v54, %v2016_v52  ;;  %v457_v57 = vrot.slane %v455_v55, 4 }
 0x543   :  { %v1589_v59 = vmul.f32 -1.442695, %v435_v56  ;;  %458 = vrot.lane.b32.xlu2 %v457_v57, %s1791_s27 }
 0x545   :  { %1659 = vpow2.f32 %v1589_v59 }
 0x546   :  { %v517_v60 = vpop.f32.mrf.mxu2 }
 0x547   :  { %v540_v61 = vadd.f32 %v517_v60, %v2120_v35  ;;  %v520_v26 = vadd.f32 %v517_v60, %v496_v21 }
 0x549   :  { %542 = vrot.lane.b32.xlu0 %v540_v61, %s1791_s27  ;;  %v1592_v27 = vmul.f32 -1.442695, %v520_v26 }
 0x54b   :  { %v1660_v62 = vpop.eup %1659 }
 0x54c   :  { %v439_v63 = vadd.f32 1.0, %v1660_v62 }
 0x54e   :  { %1661 = vrcp.f32 %v439_v63  ;;  %v451_v6 = vand.u32 2147483648, %v439_v63  ;;  %v449_v8 = vand.u32 2147483647, %v439_v63  ;;  %vm445_vm2 = vweird.f32 %v439_v63 }
 0x54f   :  { %1663 = vpow2.f32 %v1592_v27 }
 0x550   :  { %v452_v12 = vor.u32 1.1754944e-38, %v451_v6  ;;  %vm450_vm4 = vcmp.eq.f32.partialorder %v449_v8, 8.507059e+37 }
 0x554   :  { %v1662_v0 = vpop.eup %1661 }
 0x555   :  { %v441_v3 = vmul.f32 %v1662_v0, %v439_v63  ;;  %vm446_vm1 = vweird.f32 %v1662_v0  ;;  %v1664_v29 = vpop.eup %1663 }
 0x556   :  { %vm447_vm3 = vmor %vm445_vm2, %vm446_vm1  ;;  %v524_v30 = vadd.f32 1.0, %v1664_v29 }
 0x557   :  { %v442_v5 = vsub.f32 1.0, %v441_v3 }
 0x558   :  { %1665 = vrcp.f32 %v524_v30  ;;  %v536_v39 = vand.u32 2147483648, %v524_v30  ;;  %vm530_vm6 = vweird.f32 %v524_v30  ;;  %v534_v40 = vand.u32 2147483647, %v524_v30 }
 0x559   :  { %v443_v7 = vmul.f32 %v1662_v0, %v442_v5 }
 0x55a   :  { %v537_v43 = vor.u32 1.1754944e-38, %v536_v39  ;;  %vm535_vm8 = vcmp.eq.f32.partialorder %v534_v40, 8.507059e+37 }
 0x55b   :  { %v444_v10 = vadd.f32 %v1662_v0, %v443_v7 }
 0x55d   :  { %v448_v17 = vsel %vm447_vm3, %v1662_v0, %v444_v10 }
 0x55e   :  { %v453_v18 = vsel %vm450_vm4, %v452_v12, %v448_v17  ;;  %v1666_v33 = vpop.eup %1665 }
 0x55f   :  { %v476_v19 = vmul.f32 %v474_v16, %v453_v18  ;;  %v526_v34 = vmul.f32 %v1666_v33, %v524_v30  ;;  %vm531_vm5 = vweird.f32 %v1666_v33  ;;  %v468_v59 = vsub.f32 1.0, %v453_v18 }
 0x560   :  { %vm532_vm7 = vmor %vm530_vm6, %vm531_vm5 }
 0x561   :  { %v527_v36 = vsub.f32 1.0, %v526_v34 }
 0x563   :  { %v528_v37 = vmul.f32 %v1666_v33, %v527_v36 }
 0x565   :  { %v529_v38 = vadd.f32 %v1666_v33, %v528_v37 }
 0x567   :  { %v533_v28 = vsel %vm532_vm7, %v1666_v33, %v529_v38 }
 0x568   :  { %v538_v47 = vsel %vm535_vm8, %v537_v43, %v533_v28 }
 0x569   :  { %v552_v63 = vsub.f32 1.0, %v538_v47  ;;  %v558_v5 = vmul.f32 %v538_v47, %v2139_v49 }
 0x59d   :  { %v459_v31 = vpop.permute.xlu2 %458 }
 0x59e   :  { %v461_v32 = vmul.f32 %v459_v31, %v453_v18 }
 0x5a0   :  { %463 = vrot.lane.b32.xlu1 %v461_v32, %s1791_s27 }
 0x5bb   :  { %v543_v46 = vpop.permute.xlu0 %542 }
 0x5bc   :  { %v545_v50 = vmul.f32 %v543_v46, %v538_v47 }
 0x5be   :  { %547 = vrot.lane.b32.xlu2 %v545_v50, %s1791_s27 }
 0x612   :  { %v464_v51 = vpop.permute.xlu1 %463 }
 0x613   :  { %v466_v53 = vadd.f32 %v464_v51, %v2016_v52 }
 0x615   :  { %1667 = vtanh.f32 %v466_v53 }
 0x618   :  { %v548_v54 = vpop.permute.xlu2 %547 }
 0x619   :  { %v550_v55 = vadd.f32 %v548_v54, %v496_v21 }
 0x61b   :  { %v1668_v56 = vpop.eup %1667  ;;  %1669 = vtanh.f32 %v550_v55 }
 0x61c   :  { %470 = vrot.lane.b32.xlu0 %v1668_v56, %s1793_s15 }
 0x621   :  { %v1670_v57 = vpop.eup %1669 }
 0x622   :  { %554 = vrot.lane.b32.xlu1 %v1670_v57, %s1793_s15 }
 0x68e   :  { %v471_v60 = vpop.permute.xlu0 %470 }
 0x68f   :  { %v473_v61 = vmul.f32 %v471_v60, %v468_v59 }
 0x691   :  { %v2170_v62 = vadd.f32 %v476_v19, %v473_v61 }
 0x693   :  { %v566_v0 = vrot.slane %v2170_v62, 4 }
 0x694   :  { %v555_v3 = vpop.permute.xlu1 %554 }
 0x695   :  { %v557_v6 = vmul.f32 %v555_v3, %v552_v63  ;;  %567 = vrot.lane.b32.xlu2 %v566_v0, %s1793_s15 }
 0x697   :  { %v2175_v7 = vadd.f32 %v558_v5, %v557_v6 }
 0x699   :  { %561 = vrot.lane.b32.xlu0 %v2175_v7, %s1793_s15 }
 0x6ef   :  { %v568_v8 = vpop.permute.xlu2 %567 }
 0x6f0   :  { %1593 = vmatmul.msk.f32.vlgmr.msrb.gmra.mxu3 %vm163_vm0, %v568_v8  ;;  %1595 = vmatmul.msk.f32.vlgmr.msra.gmra.mxu2 %vm163_vm0, %v568_v8  ;;  %v60_v8 = vld [vmem:[%s2411_s0 + $0x8] sm:$0xff] }
 0x6f1   :  { %895 = vmatpush.msrb.mxu3 %v1861_v1  ;;  %1054 = vmatpush.msra.mxu2 %v1861_v1 }
 0x6f3   :  { %896 = vmatpush.msrb.mxu3 %v1866_v2  ;;  %1055 = vmatpush.msra.mxu2 %v1866_v2 }
 0x6f5   :  { %897 = vmatpush.msrb.mxu3 %v1872_v4  ;;  %1056 = vmatpush.msra.mxu2 %v1872_v4 }
 0x6f7   :  { %898 = vmatpush.msrb.mxu3 %v1891_v9  ;;  %1057 = vmatpush.msra.mxu2 %v1891_v9 }
 0x70b   :  { %v562_v49 = vpop.permute.xlu0 %561 }
 0x70c   :  { %564 = vst.msk [vmem:[#allocation2 + $0x2] sm:$0x3] %vm404_vm15, %v562_v49  ;;  %1596 = vmatmul.msk.f32.vlgmr.msra.gmra.mxu3 %vm163_vm0, %v562_v49 }
 0x70d   :  { %1120 = vmatpush.msra.mxu3 %v2027_v13 }
 0x70f   :  { %1121 = vmatpush.msra.mxu3 %v2032_v14 }
 0x711   :  { %1122 = vmatpush.msra.mxu3 %v2039_v15 }
 0x713   :  { %1123 = vmatpush.msra.mxu3 %v2047_v11 }
 0x773   :  { %v588_v10 = vpop.f32.mrf.mxu3  ;;  %v654_v20 = vpop.f32.mrf.mxu2 }
 0x774   :  { %v614_v12 = vadd.f32 %v588_v10, %v2006_v45  ;;  %v592_v19 = vrot.slane %v588_v10, 2  ;;  %v655_v26 = vadd.f32 %v2128_v58, %v654_v20 }
 0x776   :  { %v616_v16 = vrot.slane %v614_v12, 2  ;;  %v594_v21 = vadd.f32 %v592_v19, %v2016_v52  ;;  %v633_v19 = vrot.slane %v2170_v62, 6 }
 0x778   :  { %617 = vrot.lane.b32.xlu1 %v616_v16, %s1791_s27  ;;  %v1594_v29 = vmul.f32 -1.442695, %v594_v21 }
 0x77a   :  { %1671 = vpow2.f32 %v1594_v29 }
 0x780   :  { %v1672_v31 = vpop.eup %1671 }
 0x781   :  { %v598_v33 = vadd.f32 1.0, %v1672_v31 }
 0x783   :  { %v610_v50 = vand.u32 2147483648, %v598_v33  ;;  %vm604_vm10 = vweird.f32 %v598_v33  ;;  %v608_v51 = vand.u32 2147483647, %v598_v33 }
 0x785   :  { %v611_v57 = vor.u32 1.1754944e-38, %v610_v50  ;;  %vm609_vm1 = vcmp.eq.f32.partialorder %v608_v51, 8.507059e+37 }
 0x78f   :  { %v676_v17 = vpop.f32.mrf.mxu3 }
 0x790   :  { %v699_v18 = vadd.f32 %v676_v17, %v2120_v35  ;;  %v679_v27 = vadd.f32 %v676_v17, %v655_v26 }
 0x792   :  { %701 = vrot.lane.b32.xlu2 %v699_v18, %s1791_s27  ;;  %v1597_v30 = vmul.f32 -1.442695, %v679_v27 }
 0x794   :  { %1673 = vpow2.f32 %v1597_v30 }
 0x795   :  { %1675 = vrcp.f32 %v598_v33 }
 0x79a   :  { %v1674_v32 = vpop.eup %1673 }
 0x79b   :  { %v683_v34 = vadd.f32 1.0, %v1674_v32  ;;  %v1676_v36 = vpop.eup %1675 }
 0x79c   :  { %v600_v38 = vmul.f32 %v1676_v36, %v598_v33  ;;  %vm605_vm9 = vweird.f32 %v1676_v36 }
 0x79d   :  { %1677 = vrcp.f32 %v683_v34  ;;  %vm606_vm12 = vmor %vm604_vm10, %vm605_vm9  ;;  %v695_v54 = vand.u32 2147483648, %v683_v34  ;;  %vm689_vm13 = vweird.f32 %v683_v34  ;;  %v693_v56 = vand.u32 2147483647, %v683_v34 }
 0x79e   :  { %v601_v40 = vsub.f32 1.0, %v600_v38 }
 0x79f   :  { %v696_v63 = vor.u32 1.1754944e-38, %v695_v54  ;;  %vm694_vm2 = vcmp.eq.f32.partialorder %v693_v56, 8.507059e+37 }
 0x7a0   :  { %v602_v43 = vmul.f32 %v1676_v36, %v601_v40 }
 0x7a2   :  { %v603_v47 = vadd.f32 %v1676_v36, %v602_v43 }
 0x7a3   :  { %v1678_v37 = vpop.eup %1677 }
 0x7a4   :  { %v685_v39 = vmul.f32 %v1678_v37, %v683_v34  ;;  %vm690_vm11 = vweird.f32 %v1678_v37  ;;  %v607_v55 = vsel %vm606_vm12, %v1676_v36, %v603_v47 }
 0x7a5   :  { %vm691_vm14 = vmor %vm689_vm13, %vm690_vm11  ;;  %v612_v60 = vsel %vm609_vm1, %v611_v57, %v607_v55 }
 0x7a6   :  { %v686_v28 = vsub.f32 1.0, %v685_v39  ;;  %v627_v20 = vsub.f32 1.0, %v612_v60 }
 0x7a8   :  { %v687_v46 = vmul.f32 %v1678_v37, %v686_v28 }
 0x7aa   :  { %v688_v53 = vadd.f32 %v1678_v37, %v687_v46 }
 0x7ac   :  { %v692_v59 = vsel %vm691_vm14, %v1678_v37, %v688_v53 }
 0x7ad   :  { %v697_v5 = vsel %vm694_vm2, %v696_v63, %v692_v59 }
 0x7ae   :  { %v711_v62 = vsub.f32 1.0, %v697_v5 }
 0x7ea   :  { %v618_v61 = vpop.permute.xlu1 %617 }
 0x7eb   :  { %v620_v0 = vmul.f32 %v618_v61, %v612_v60 }
 0x7ec   :  { %v702_v3 = vpop.permute.xlu2 %701 }
 0x7ed   :  { %v704_v6 = vmul.f32 %v702_v3, %v697_v5  ;;  %622 = vrot.lane.b32.xlu0 %v620_v0, %s1791_s27 }
 0x7ef   :  { %706 = vrot.lane.b32.xlu1 %v704_v6, %s1791_s27 }
 0x7f7   :  { %65 = vperm.xlu1 %1636, %v60_v8  }
 0x85f   :  { %v623_v49 = vpop.permute.xlu0 %622 }
 0x860   :  { %v625_v10 = vadd.f32 %v623_v49, %v2016_v52  ;;  %v635_v52 = vmul.f32 %v633_v19, %v612_v60 }
 0x861   :  { %v707_v12 = vpop.permute.xlu1 %706 }
 0x862   :  { %1679 = vtanh.f32 %v625_v10  ;;  %v709_v16 = vadd.f32 %v707_v12, %v655_v26 }
 0x864   :  { %1681 = vtanh.f32 %v709_v16 }
 0x868   :  { %v1680_v17 = vpop.eup %1679 }
 0x869   :  { %629 = vrot.lane.b32.xlu2 %v1680_v17, %s1793_s15  ;;  %v66_v21 = vpop.permute.xlu1 %65 }
 0x86a   :  { %v1682_v18 = vpop.eup %1681  ;;  %vm69_vm3 = vcmp.eq.s32.totalorder %v66_v21, %v1997_v41  ;;  %vm70_vm4 = vcmp.eq.s32.totalorder %v66_v21, %v2000_v42  ;;  %v717_v41 = vmul.f32 %v697_v5, %v2175_v7 }
 0x86b   :  { %713 = vrot.lane.b32.xlu0 %v1682_v18, %s1793_s15  ;;  %1577 = vmatmul.msk.f32.gmra.mxu0 %vm69_vm3, %v1792_v44 }
 0x86c   :  { %1579 = vmatmul.msk.f32.gmra.mxu1 %vm70_vm4, %v1792_v44 }
 0x8c3   :  { %v630_v27 = vpop.permute.xlu2 %629 }
 0x8c4   :  { %v632_v29 = vmul.f32 %v630_v27, %v627_v20 }
 0x8c6   :  { %v2214_v26 = vadd.f32 %v635_v52, %v632_v29 }
 0x8c8   :  { %v725_v30 = vrot.slane %v2214_v26, 6 }
 0x8ca   :  { %726 = vrot.lane.b32.xlu2 %v725_v30, %s1793_s15 }
 0x8dd   :  { %v714_v31 = vpop.permute.xlu0 %713 }
 0x8de   :  { %v716_v32 = vmul.f32 %v714_v31, %v711_v62 }
 0x8e0   :  { %v2221_v42 = vadd.f32 %v717_v41, %v716_v32 }
 0x8e2   :  { %720 = vrot.lane.b32.xlu0 %v2221_v42, %s1793_s15 }
 0x8e9   :  { %v157_v36 = vpop.f32.mrf.mxu1 }
 0x924   :  { %v727_v33 = vpop.permute.xlu2 %726 }
 0x925   :  { %1598 = vmatmul.msk.f32.vlgmr.msrb.gmra.mxu0 %vm163_vm0, %v727_v33  ;;  %1600 = vmatmul.msk.f32.vlgmr.msrb.gmra.mxu1 %vm163_vm0, %v727_v33 }
 0x926   :  { %1142 = vmatpush.msrb.mxu0 %v2067_v22  ;;  %1213 = vmatpush.msrb.mxu1 %v1861_v1  ;;  %v134_v1 = vpop.f32.mrf.mxu0 }
 0x927   :  { %v135_v34 = vadd.f32 %v2013_v48, %v134_v1 }
 0x928   :  { %1143 = vmatpush.msrb.mxu0 %v2072_v23  ;;  %1214 = vmatpush.msrb.mxu1 %v1866_v2 }
 0x929   :  { %v2246_v37 = vadd.f32 %v157_v36, %v135_v34 }
 0x92a   :  { %1144 = vmatpush.msrb.mxu0 %v2079_v24  ;;  %1215 = vmatpush.msrb.mxu1 %v1872_v4 }
 0x92c   :  { %1145 = vmatpush.msrb.mxu0 %v2086_v25  ;;  %1216 = vmatpush.msrb.mxu1 %v1891_v9 }
 0x954   :  { %v721_v44 = vpop.permute.xlu0 %720 }
 0x955   :  { %723 = vst.msk [vmem:[#allocation2 + $0x4] sm:$0x3] %vm404_vm15, %v721_v44  ;;  %1601 = vmatmul.msk.f32.vlgmr.msrb.gmra.mxu2 %vm163_vm0, %v721_v44 }
 0x956   :  { %1279 = vmatpush.msrb.mxu2 %v2027_v13 }
 0x958   :  { %1280 = vmatpush.msrb.mxu2 %v2032_v14 }
 0x95a   :  { %1281 = vmatpush.msrb.mxu2 %v2039_v15 }
 0x95c   :  { %1282 = vmatpush.msrb.mxu2 %v2047_v11 }
 0x9a2   :  { %v747_v2 = vpop.f32.mrf.mxu0  ;;  %v808_v43 = vpop.f32.mrf.mxu1 }
 0x9a3   :  { %v770_v4 = vadd.f32 %v747_v2, %v2006_v45  ;;  %v750_v38 = vadd.f32 %v747_v2, %v2246_v37  ;;  %v809_v47 = vadd.f32 %v2128_v58, %v808_v43 }
 0x9a5   :  { %772 = vrot.lane.b32.xlu1 %v770_v4, %s1791_s27  ;;  %v1599_v39 = vmul.f32 -1.442695, %v750_v38 }
 0x9a7   :  { %1683 = vpow2.f32 %v1599_v39 }
 0x9ad   :  { %v1684_v40 = vpop.eup %1683 }
 0x9ae   :  { %v754_v28 = vadd.f32 1.0, %v1684_v40 }
 0x9b0   :  { %1685 = vrcp.f32 %v754_v28  ;;  %v766_v56 = vand.u32 2147483648, %v754_v28  ;;  %vm760_vm6 = vweird.f32 %v754_v28  ;;  %v764_v59 = vand.u32 2147483647, %v754_v28 }
 0x9b2   :  { %v767_v63 = vor.u32 1.1754944e-38, %v766_v56  ;;  %vm765_vm8 = vcmp.eq.f32.partialorder %v764_v59, 8.507059e+37 }
 0x9b6   :  { %v1686_v46 = vpop.eup %1685 }
 0x9b7   :  { %v756_v51 = vmul.f32 %v1686_v46, %v754_v28  ;;  %vm761_vm5 = vweird.f32 %v1686_v46 }
 0x9b8   :  { %vm762_vm7 = vmor %vm760_vm6, %vm761_vm5 }
 0x9b9   :  { %v757_v54 = vsub.f32 1.0, %v756_v51 }
 0x9bb   :  { %v758_v48 = vmul.f32 %v1686_v46, %v757_v54 }
 0x9bd   :  { %v759_v55 = vadd.f32 %v1686_v46, %v758_v48 }
 0x9bf   :  { %v763_v60 = vsel %vm762_vm7, %v1686_v46, %v759_v55 }
 0x9c0   :  { %v768_v3 = vsel %vm765_vm8, %v767_v63, %v763_v60 }
 0x9c1   :  { %v782_v33 = vsub.f32 1.0, %v768_v3  ;;  %v789_v1 = vmul.f32 %v768_v3, %v725_v30 }
 0x9d8   :  { %v830_v9 = vpop.f32.mrf.mxu2 }
 0x9d9   :  { %v853_v7 = vadd.f32 %v830_v9, %v2120_v35  ;;  %v833_v50 = vadd.f32 %v830_v9, %v809_v47 }
 0x9db   :  { %855 = vrot.lane.b32.xlu2 %v853_v7, %s1791_s27  ;;  %v1602_v53 = vmul.f32 -1.442695, %v833_v50 }
 0x9dd   :  { %1687 = vpow2.f32 %v1602_v53 }
 0x9e3   :  { %v1688_v57 = vpop.eup %1687 }
 0x9e4   :  { %v837_v61 = vadd.f32 1.0, %v1688_v57 }
 0x9e6   :  { %1689 = vrcp.f32 %v837_v61  ;;  %v849_v16 = vand.u32 2147483648, %v837_v61  ;;  %vm843_vm10 = vweird.f32 %v837_v61  ;;  %v847_v17 = vand.u32 2147483647, %v837_v61 }
 0x9e8   :  { %v850_v19 = vor.u32 1.1754944e-38, %v849_v16  ;;  %vm848_vm12 = vcmp.eq.f32.partialorder %v847_v17, 8.507059e+37 }
 0x9ec   :  { %v1690_v6 = vpop.eup %1689 }
 0x9ed   :  { %v839_v8 = vmul.f32 %v1690_v6, %v837_v61  ;;  %vm844_vm9 = vweird.f32 %v1690_v6 }
 0x9ee   :  { %vm845_vm11 = vmor %vm843_vm10, %vm844_vm9 }
 0x9ef   :  { %v840_v49 = vsub.f32 1.0, %v839_v8 }
 0x9f1   :  { %v841_v10 = vmul.f32 %v1690_v6, %v840_v49 }
 0x9f3   :  { %v842_v12 = vadd.f32 %v1690_v6, %v841_v10 }
 0x9f5   :  { %v846_v18 = vsel %vm845_vm11, %v1690_v6, %v842_v12 }
 0x9f6   :  { %v851_v21 = vsel %vm848_vm12, %v850_v19, %v846_v18 }
 0x9f7   :  { %v865_v9 = vsub.f32 1.0, %v851_v21  ;;  %v871_v34 = vmul.f32 %v851_v21, %v2221_v42 }
 0xa17   :  { %v773_v0 = vpop.permute.xlu1 %772 }
 0xa18   :  { %v775_v5 = vmul.f32 %v773_v0, %v768_v3 }
 0xa1a   :  { %777 = vrot.lane.b32.xlu0 %v775_v5, %s1791_s27 }
 0xa35   :  { %v856_v20 = vpop.permute.xlu2 %855 }
 0xa36   :  { %v858_v27 = vmul.f32 %v856_v20, %v851_v21 }
 0xa38   :  { %860 = vrot.lane.b32.xlu1 %v858_v27, %s1791_s27 }
 0xa8c   :  { %v778_v52 = vpop.permute.xlu0 %777 }
 0xa8d   :  { %v780_v29 = vadd.f32 %v778_v52, %v2246_v37 }
 0xa8f   :  { %1691 = vtanh.f32 %v780_v29 }
 0xa95   :  { %v1692_v62 = vpop.eup %1691 }
 0xa96   :  { %784 = vrot.lane.b32.xlu2 %v1692_v62, %s1793_s15 }
 0xaaa   :  { %v861_v31 = vpop.permute.xlu1 %860 }
 0xaab   :  { %v863_v41 = vadd.f32 %v861_v31, %v809_v47 }
 0xaad   :  { %1693 = vtanh.f32 %v863_v41 }
 0xab3   :  { %v1694_v32 = vpop.eup %1693 }
 0xab4   :  { %867 = vrot.lane.b32.xlu0 %v1694_v32, %s1793_s15 }
 0xaf0   :  { %v785_v44 = vpop.permute.xlu2 %784 }
 0xaf1   :  { %v787_v2 = vmul.f32 %v785_v44, %v782_v33 }
 0xaf3   :  { %v2257_v4 = vadd.f32 %v789_v1, %v787_v2 }
 0xaf5   :  { %879 = vrot.lane.b32.xlu1 %v2257_v4, %s1793_s15  ;;  %v945_v41 = vrot.slane %v2257_v4, 6 }
 0xb26   :  { %v868_v7 = vpop.permute.xlu0 %867 }
 0xb27   :  { %v870_v36 = vmul.f32 %v868_v7, %v865_v9 }
 0xb29   :  { %v2262_v38 = vadd.f32 %v871_v34, %v870_v36 }
 0xb2b   :  { %874 = vrot.lane.b32.xlu2 %v2262_v38, %s1793_s15 }
 0xb67   :  { %v880_v39 = vpop.permute.xlu1 %879 }
 0xb68   :  { %1603 = vmatmul.msk.f32.vlgmr.msrb.gmra.mxu3 %vm163_vm0, %v880_v39  ;;  %1605 = vmatmul.msk.f32.vlgmr.msra.gmra.mxu0 %vm163_vm0, %v880_v39 }
 0xb69   :  { %1301 = vmatpush.msrb.mxu3 %v2067_v22  ;;  %1372 = vmatpush.msra.mxu0 %v2027_v13 }
 0xb6b   :  { %1302 = vmatpush.msrb.mxu3 %v2072_v23  ;;  %1373 = vmatpush.msra.mxu0 %v2032_v14 }
 0xb6d   :  { %1303 = vmatpush.msrb.mxu3 %v2079_v24  ;;  %1374 = vmatpush.msra.mxu0 %v2039_v15 }
 0xb6f   :  { %1304 = vmatpush.msrb.mxu3 %v2086_v25  ;;  %1375 = vmatpush.msra.mxu0 %v2047_v11 }
 0xb85   :  { %v875_v26 = vpop.permute.xlu2 %874 }
 0xb86   :  { %877 = vst.msk [vmem:[#allocation2 + $0x6] sm:$0x3] %vm404_vm15, %v875_v26  ;;  %1606 = vmatmul.msk.f32.vlgmr.msra.gmra.mxu1 %vm163_vm0, %v875_v26 }
 0xb87   :  { %1394 = vmatpush.msra.mxu1 %v2067_v22 }
 0xb89   :  { %1395 = vmatpush.msra.mxu1 %v2072_v23 }
 0xb8b   :  { %1396 = vmatpush.msra.mxu1 %v2079_v24 }
 0xb8d   :  { %1397 = vmatpush.msra.mxu1 %v2086_v25 }
 0xbe5   :  { %v966_v24 = vpop.f32.mrf.mxu0 }
 0xbe6   :  { %v967_v25 = vadd.f32 %v2128_v58, %v966_v24 }
 0xbeb   :  { %v900_v13 = vpop.f32.mrf.mxu3 }
 0xbec   :  { %v926_v14 = vadd.f32 %v900_v13, %v2006_v45  ;;  %v904_v42 = vrot.slane %v900_v13, 6 }
 0xbee   :  { %v928_v15 = vrot.slane %v926_v14, 6  ;;  %v906_v22 = vadd.f32 %v904_v42, %v2246_v37 }
 0xbf0   :  { %929 = vrot.lane.b32.xlu0 %v928_v15, %s1791_s27  ;;  %v1604_v40 = vmul.f32 -1.442695, %v906_v22 }
 0xbf2   :  { %1695 = vpow2.f32 %v1604_v40 }
 0xbf8   :  { %v1696_v23 = vpop.eup %1695 }
 0xbf9   :  { %v910_v28 = vadd.f32 1.0, %v1696_v23 }
 0xbfb   :  { %1697 = vrcp.f32 %v910_v28  ;;  %v922_v56 = vand.u32 2147483648, %v910_v28  ;;  %vm916_vm14 = vweird.f32 %v910_v28  ;;  %v920_v57 = vand.u32 2147483647, %v910_v28 }
 0xbfd   :  { %v923_v60 = vor.u32 1.1754944e-38, %v922_v56  ;;  %vm921_vm2 = vcmp.eq.f32.partialorder %v920_v57, 8.507059e+37 }
 0xc01   :  { %v1698_v47 = vpop.eup %1697 }
 0xc02   :  { %v912_v50 = vmul.f32 %v1698_v47, %v910_v28  ;;  %vm917_vm13 = vweird.f32 %v1698_v47 }
 0xc03   :  { %v988_v11 = vpop.f32.mrf.mxu1  ;;  %vm918_vm1 = vmor %vm916_vm14, %vm917_vm13 }
 0xc04   :  { %v1011_v30 = vadd.f32 %v988_v11, %v2120_v35  ;;  %v991_v43 = vadd.f32 %v988_v11, %v967_v25  ;;  %v913_v51 = vsub.f32 1.0, %v912_v50 }
 0xc06   :  { %1013 = vrot.lane.b32.xlu1 %v1011_v30, %s1791_s27  ;;  %v1607_v46 = vmul.f32 -1.442695, %v991_v43  ;;  %v914_v54 = vmul.f32 %v1698_v47, %v913_v51 }
 0xc08   :  { %1699 = vpow2.f32 %v1607_v46  ;;  %v915_v55 = vadd.f32 %v1698_v47, %v914_v54 }
 0xc0a   :  { %v919_v59 = vsel %vm918_vm1, %v1698_v47, %v915_v55 }
 0xc0b   :  { %v924_v63 = vsel %vm921_vm2, %v923_v60, %v919_v59 }
 0xc0c   :  { %v939_v32 = vsub.f32 1.0, %v924_v63  ;;  %v947_v44 = vmul.f32 %v945_v41, %v924_v63 }
 0xc0e   :  { %v1700_v53 = vpop.eup %1699 }
 0xc0f   :  { %v995_v48 = vadd.f32 1.0, %v1700_v53 }
 0xc11   :  { %1701 = vrcp.f32 %v995_v48  ;;  %v1007_v10 = vand.u32 2147483648, %v995_v48  ;;  %vm1001_vm4 = vweird.f32 %v995_v48  ;;  %v1005_v12 = vand.u32 2147483647, %v995_v48 }
 0xc13   :  { %v1008_v17 = vor.u32 1.1754944e-38, %v1007_v10  ;;  %vm1006_vm6 = vcmp.eq.f32.partialorder %v1005_v12, 8.507059e+37 }
 0xc17   :  { %v1702_v61 = vpop.eup %1701 }
 0xc18   :  { %v997_v5 = vmul.f32 %v1702_v61, %v995_v48  ;;  %vm1002_vm3 = vweird.f32 %v1702_v61 }
 0xc19   :  { %vm1003_vm5 = vmor %vm1001_vm4, %vm1002_vm3 }
 0xc1a   :  { %v998_v6 = vsub.f32 1.0, %v997_v5 }
 0xc1c   :  { %v999_v8 = vmul.f32 %v1702_v61, %v998_v6 }
 0xc1e   :  { %v1000_v49 = vadd.f32 %v1702_v61, %v999_v8 }
 0xc20   :  { %v1004_v16 = vsel %vm1003_vm5, %v1702_v61, %v1000_v49 }
 0xc21   :  { %v1009_v19 = vsel %vm1006_vm6, %v1008_v17, %v1004_v16 }
 0xc22   :  { %v1023_v7 = vsub.f32 1.0, %v1009_v19  ;;  %v1029_v36 = vmul.f32 %v1009_v19, %v2262_v38 }
 0xc62   :  { %v930_v0 = vpop.permute.xlu0 %929 }
 0xc63   :  { %v932_v3 = vmul.f32 %v930_v0, %v924_v63 }
 0xc65   :  { %934 = vrot.lane.b32.xlu2 %v932_v3, %s1791_s27 }
 0xc78   :  { %v1014_v18 = vpop.permute.xlu1 %1013 }
 0xc79   :  { %v1016_v20 = vmul.f32 %v1014_v18, %v1009_v19 }
 0xc7b   :  { %1018 = vrot.lane.b32.xlu0 %v1016_v20, %s1791_s27 }
 0xcbf   :  { %v935_v21 = vpop.permute.xlu2 %934 }
 0xcc0   :  { %v937_v27 = vadd.f32 %v935_v21, %v2246_v37 }
 0xcc2   :  { %1703 = vtanh.f32 %v937_v27 }
 0xcc8   :  { %v1704_v52 = vpop.eup %1703 }
 0xcc9   :  { %941 = vrot.lane.b32.xlu1 %v1704_v52, %s1793_s15 }
 0xced   :  { %v1019_v29 = vpop.permute.xlu0 %1018 }
 0xcee   :  { %v1021_v62 = vadd.f32 %v1019_v29, %v967_v25 }
 0xcf0   :  { %1705 = vtanh.f32 %v1021_v62 }
 0xcf6   :  { %v1706_v31 = vpop.eup %1705 }
 0xcf7   :  { %1025 = vrot.lane.b32.xlu2 %v1706_v31, %s1793_s15 }
 0xd3b   :  { %v942_v33 = vpop.permute.xlu1 %941 }
 0xd3c   :  { %v944_v1 = vmul.f32 %v942_v33, %v939_v32 }
 0xd3e   :  { %v2294_v2 = vadd.f32 %v947_v44, %v944_v1 }
 0xd40   :  { %v1037_v9 = vrot.slane %v2294_v2, 2  ;;  %v1104_v31 = vrot.slane %v2294_v2, 6  ;;  %v1456_v2 = vld [vmem:[%s2417_s6 + $0x38] sm:$0xff] }
 0xd42   :  { %1038 = vrot.lane.b32.xlu0 %v1037_v9, %s1793_s15 }
 0xd51   :  { %v1026_v34 = vpop.permute.xlu2 %1025 }
 0xd52   :  { %v1028_v39 = vmul.f32 %v1026_v34, %v1023_v7 }
 0xd54   :  { %v2299_v26 = vadd.f32 %v1029_v36, %v1028_v39 }
 0xd56   :  { %1032 = vrot.lane.b32.xlu1 %v2299_v26, %s1793_s15 }
 0xdb4   :  { %v1039_v4 = vpop.permute.xlu0 %1038 }
 0xdb5   :  { %1608 = vmatmul.msk.f32.vlgmr.msra.gmra.mxu2 %vm163_vm0, %v1039_v4  ;;  %1610 = vmatmul.msk.f32.vlgmr.msra.gmra.mxu3 %vm163_vm0, %v1039_v4 }
 0xdb6   :  { %1504 = vmatpush.msra.mxu3 %v1456_v2 }
 0xdc8   :  { %v1033_v13 = vpop.permute.xlu1 %1032 }
 0xdc9   :  { %1035 = vst.msk [vmem:[#allocation2 + $0x8] sm:$0x3] %vm404_vm15, %v1033_v13  ;;  %1611 = vmatmul.msk.f32.vlgmr.msrb.gmra.mxu0 %vm163_vm0, %v1033_v13  ;;  %v1454_v13 = vld [vmem:[%s2417_s6 + $0x28] sm:$0xff] }
 0xdca   :  { %1505 = vmatpush.msra.mxu3 %v1454_v13 }
 0xe38   :  { %v1059_v14 = vpop.f32.mrf.mxu2  ;;  %v1125_v42 = vpop.f32.mrf.mxu3 }
 0xe39   :  { %v1085_v15 = vadd.f32 %v1059_v14, %v2006_v45  ;;  %v1126_v22 = vadd.f32 %v2128_v58, %v1125_v42  ;;  %v1063_v24 = vrot.slane %v1059_v14, 4  ;;  %v1452_v14 = vld [vmem:[%s2417_s6 + $0x18] sm:$0xff] }
 0xe3a   :  { %1506 = vmatpush.msra.mxu3 %v1452_v14 }
 0xe3b   :  { %v1087_v38 = vrot.slane %v1085_v15, 4  ;;  %v1065_v28 = vadd.f32 %v1063_v24, %v2246_v37  ;;  %v1455_v15 = vld [vmem:[%s2417_s6 + $0x30] sm:$0xff] }
 0xe3c   :  { %1481 = vmatpush.msra.mxu2 %v1455_v15 }
 0xe3d   :  { %1088 = vrot.lane.b32.xlu0 %v1087_v38, %s1791_s27  ;;  %v1609_v43 = vmul.f32 -1.442695, %v1065_v28  ;;  %v1453_v38 = vld [vmem:[%s2417_s6 + $0x20] sm:$0xff] }
 0xe3e   :  { %1482 = vmatpush.msra.mxu2 %v1453_v38  ;;  %v2362_v28 = vld [vmem:[%s2418_s7] sm:$0x3] }
 0xe46   :  { %v1147_v11 = vpop.f32.mrf.mxu0 }
 0xe47   :  { %v1170_v30 = vadd.f32 %v1147_v11, %v2120_v35  ;;  %v1150_v40 = vadd.f32 %v1147_v11, %v1126_v22  ;;  %v1451_v11 = vld [vmem:[%s2417_s6 + $0x10] sm:$0xff] }
 0xe48   :  { %1483 = vmatpush.msra.mxu2 %v1451_v11 }
 0xe49   :  { %1172 = vrot.lane.b32.xlu2 %v1170_v30, %s1791_s27  ;;  %v1612_v23 = vmul.f32 -1.442695, %v1150_v40  ;;  %v1449_v30 = vld [vmem:[%s2417_s6] sm:$0xff] }
 0xe4a   :  { %1484 = vmatpush.msra.mxu2 %v1449_v30 }
 0xe4b   :  { %1707 = vpow2.f32 %v1612_v23 }
 0xe4c   :  { %1709 = vpow2.f32 %v1609_v43 }
 0xe51   :  { %v1708_v25 = vpop.eup %1707 }
 0xe52   :  { %v1154_v46 = vadd.f32 1.0, %v1708_v25  ;;  %v1710_v47 = vpop.eup %1709  ;;  %v1460_v25 = vperm.slane %v2362_v28, 1 }
 0xe53   :  { %v1069_v51 = vadd.f32 1.0, %v1710_v47 }
 0xe54   :  { %1711 = vrcp.f32 %v1154_v46  ;;  %v1166_v57 = vand.u32 2147483648, %v1154_v46  ;;  %vm1160_vm8 = vweird.f32 %v1154_v46  ;;  %v1164_v59 = vand.u32 2147483647, %v1154_v46 }
 0xe55   :  { %1713 = vrcp.f32 %v1069_v51  ;;  %v1081_v49 = vand.u32 2147483648, %v1069_v51  ;;  %vm1075_vm12 = vweird.f32 %v1069_v51  ;;  %v1079_v10 = vand.u32 2147483647, %v1069_v51 }
 0xe56   :  { %v1167_v63 = vor.u32 1.1754944e-38, %v1166_v57  ;;  %vm1165_vm10 = vcmp.eq.f32.partialorder %v1164_v59, 8.507059e+37 }
 0xe57   :  { %v1082_v16 = vor.u32 1.1754944e-38, %v1081_v49  ;;  %vm1080_vm14 = vcmp.eq.f32.partialorder %v1079_v10, 8.507059e+37 }
 0xe5a   :  { %v1712_v50 = vpop.eup %1711 }
 0xe5b   :  { %v1156_v53 = vmul.f32 %v1712_v50, %v1154_v46  ;;  %v1714_v55 = vpop.eup %1713  ;;  %vm1161_vm7 = vweird.f32 %v1712_v50 }
 0xe5c   :  { %v1071_v56 = vmul.f32 %v1714_v55, %v1069_v51  ;;  %vm1162_vm9 = vmor %vm1160_vm8, %vm1161_vm7  ;;  %vm1076_vm11 = vweird.f32 %v1714_v55 }
 0xe5d   :  { %v1157_v54 = vsub.f32 1.0, %v1156_v53  ;;  %vm1077_vm13 = vmor %vm1075_vm12, %vm1076_vm11 }
 0xe5e   :  { %v1072_v61 = vsub.f32 1.0, %v1071_v56 }
 0xe5f   :  { %v1158_v48 = vmul.f32 %v1712_v50, %v1157_v54 }
 0xe60   :  { %v1073_v6 = vmul.f32 %v1714_v55, %v1072_v61 }
 0xe61   :  { %v1159_v58 = vadd.f32 %v1712_v50, %v1158_v48 }
 0xe62   :  { %v1074_v8 = vadd.f32 %v1714_v55, %v1073_v6 }
 0xe63   :  { %v1163_v60 = vsel %vm1162_vm9, %v1712_v50, %v1159_v58  ;;  %v1459_v58 = vperm.slane %v2362_v28, 0 }
 0xe64   :  { %v1168_v3 = vsel %vm1165_vm10, %v1167_v63, %v1163_v60  ;;  %v1078_v12 = vsel %vm1077_vm13, %v1714_v55, %v1074_v8  ;;  %vm1522_vm13 = vcmask 261126  }
 0xe65   :  { %v1083_v18 = vsel %vm1080_vm14, %v1082_v16, %v1078_v12  ;;  %v1182_v7 = vsub.f32 1.0, %v1168_v3  ;;  %v1188_v36 = vmul.f32 %v1168_v3, %v2299_v26  ;;  %v1450_v26 = vld [vmem:[%s2417_s6 + $0x8] sm:$0xff] }
 0xe66   :  { %v1098_v41 = vsub.f32 1.0, %v1083_v18  ;;  %v1106_v33 = vmul.f32 %v1104_v31, %v1083_v18  ;;  %1507 = vmatpush.msra.mxu3 %v1450_v26 }
 0xea3   :  { %v1173_v0 = vpop.permute.xlu2 %1172 }
 0xea4   :  { %v1175_v5 = vmul.f32 %v1173_v0, %v1168_v3 }
 0xea6   :  { %1177 = vrot.lane.b32.xlu1 %v1175_v5, %s1791_s27 }
 0xeaf   :  { %v1089_v17 = vpop.permute.xlu0 %1088 }
 0xeb0   :  { %v1091_v19 = vmul.f32 %v1089_v17, %v1083_v18  ;;  %v1737_v17 = vld [vmem:[%s2415_s4 + $0x1] ss:$0 sm:$0xff]  ;;  %s1795_s4 = smov [#allocation5]  }
 0xeb2   :  { %1093 = vrot.lane.b32.xlu2 %v1091_v19, %s1791_s27 }
 0xf0c   :  { %v1094_v20 = vpop.permute.xlu2 %1093 }
 0xf0d   :  { %v1096_v21 = vadd.f32 %v1094_v20, %v2246_v37 }
 0xf0f   :  { %1715 = vtanh.f32 %v1096_v21 }
 0xf15   :  { %v1716_v27 = vpop.eup %1715 }
 0xf16   :  { %1100 = vrot.lane.b32.xlu1 %v1716_v27, %s1793_s15 }
 0xf18   :  { %v1178_v52 = vpop.permute.xlu1 %1177 }
 0xf19   :  { %v1180_v29 = vadd.f32 %v1178_v52, %v1126_v22  ;;  %v1447_v22 = vld [vmem:[#allocation2] sm:$0xff] }
 0xf1b   :  { %1717 = vtanh.f32 %v1180_v29 }
 0xf21   :  { %v1718_v62 = vpop.eup %1717 }
 0xf22   :  { %1184 = vrot.lane.b32.xlu0 %v1718_v62, %s1793_s15 }
 0xf88   :  { %v1101_v32 = vpop.permute.xlu1 %1100 }
 0xf89   :  { %v1103_v44 = vmul.f32 %v1101_v32, %v1098_v41 }
 0xf8b   :  { %v2319_v1 = vadd.f32 %v1106_v33, %v1103_v44 }
 0xf8d   :  { %v1196_v9 = vrot.slane %v2319_v1, 4  ;;  %v1263_v49 = vrot.slane %v2319_v1, 6 }
 0xf8f   :  { %1197 = vrot.lane.b32.xlu0 %v1196_v9, %s1793_s15 }
 0xf94   :  { %v1185_v34 = vpop.permute.xlu0 %1184 }
 0xf95   :  { %v1187_v39 = vmul.f32 %v1185_v34, %v1182_v7 }
 0xf97   :  { %v2324_v4 = vadd.f32 %v1188_v36, %v1187_v39 }
 0xf99   :  { %1191 = vrot.lane.b32.xlu2 %v2324_v4, %s1793_s15 }
 0xff3   :  { %v1192_v42 = vpop.permute.xlu2 %1191 }
 0xff4   :  { %1194 = vst.msk [vmem:[#allocation2 + $0xa] sm:$0x3] %vm404_vm15, %v1192_v42  ;;  %1616 = vmatmul.msk.f32.vlgmr.msrb.gmra.mxu3 %vm163_vm0, %v1192_v42 }
 0xffc   :  { %1623 = vmatmul.msk.f32.vlgmr.msra.gmra.mxu3 %vm163_vm0, %v1447_v22 }
0x1001   :  { %v1198_v40 = vpop.permute.xlu0 %1197 }
0x1002   :  { %1613 = vmatmul.msk.f32.vlgmr.msrb.gmra.mxu1 %vm163_vm0, %v1198_v40  ;;  %1615 = vmatmul.msk.f32.vlgmr.msrb.gmra.mxu2 %vm163_vm0, %v1198_v40 }
0x100a   :  { %1621 = vmatmul.msk.f32.vlgmr.msra.gmra.mxu2 %vm163_vm0, %v1447_v22 }
0x1077   :  { %v1306_v23 = vpop.f32.mrf.mxu3 }
0x1078   :  { %v1329_v24 = vadd.f32 %v1306_v23, %v2120_v35 }
0x107a   :  { %1331 = vrot.lane.b32.xlu1 %v1329_v24, %s1791_s27 }
0x107f   :  { %v1218_v43 = vpop.f32.mrf.mxu1  ;;  %v1509_v46 = vpop.f32.mrf.mxu3 }
0x1080   :  { %v1222_v47 = vrot.slane %v1218_v43, 2  ;;  %v1244_v50 = vadd.f32 %v1218_v43, %v2006_v45  ;;  %v1510_v51 = vadd.f32 %v1509_v46, %v1460_v25 }
0x1082   :  { %v1224_v53 = vadd.f32 %v1222_v47, %v2246_v37  ;;  %v1246_v54 = vrot.slane %v1244_v50, 2  ;;  %1516 = vst [vmem:[#allocation3 + $0x8] sm:$0xff] %v1510_v51 }
0x1084   :  { %v1614_v48 = vmul.f32 -1.442695, %v1224_v53  ;;  %1247 = vrot.lane.b32.xlu2 %v1246_v54, %s1791_s27 }
0x1085   :  { %v1284_v55 = vpop.f32.mrf.mxu2 }
0x1086   :  { %1719 = vpow2.f32 %v1614_v48  ;;  %v1285_v18 = vadd.f32 %v1737_v17, %v1284_v55 }
0x1088   :  { %v1309_v19 = vadd.f32 %v1306_v23, %v1285_v18 }
0x108a   :  { %v1617_v20 = vmul.f32 -1.442695, %v1309_v19 }
0x108c   :  { %v1720_v56 = vpop.eup %1719 }
0x108d   :  { %v1228_v57 = vadd.f32 1.0, %v1720_v56  ;;  %v1486_v59 = vpop.f32.mrf.mxu2 }
0x108e   :  { %v1487_v45 = vadd.f32 %v1486_v59, %v1459_v58 }
0x108f   :  { %1721 = vrcp.f32 %v1228_v57  ;;  %v1240_v0 = vand.u32 2147483648, %v1228_v57  ;;  %v1238_v5 = vand.u32 2147483647, %v1228_v57  ;;  %vm1234_vm2 = vweird.f32 %v1228_v57 }
0x1090   :  { %1515 = vst [vmem:[#allocation3] sm:$0xff] %v1487_v45  ;;  %1723 = vpow2.f32 %v1617_v20 }
0x1091   :  { %v1241_v8 = vor.u32 1.1754944e-38, %v1240_v0  ;;  %vm1239_vm4 = vcmp.eq.f32.partialorder %v1238_v5, 8.507059e+37 }
0x1095   :  { %v1722_v60 = vpop.eup %1721 }
0x1096   :  { %v1230_v61 = vmul.f32 %v1722_v60, %v1228_v57  ;;  %vm1235_vm1 = vweird.f32 %v1722_v60  ;;  %v1724_v21 = vpop.eup %1723 }
0x1097   :  { %vm1236_vm3 = vmor %vm1234_vm2, %vm1235_vm1  ;;  %v1313_v27 = vadd.f32 1.0, %v1724_v21 }
0x1098   :  { %v1231_v63 = vsub.f32 1.0, %v1230_v61 }
0x1099   :  { %1725 = vrcp.f32 %v1313_v27  ;;  %v1325_v44 = vand.u32 2147483648, %v1313_v27  ;;  %vm1319_vm6 = vweird.f32 %v1313_v27  ;;  %v1323_v1 = vand.u32 2147483647, %v1313_v27 }
0x109a   :  { %v1232_v3 = vmul.f32 %v1722_v60, %v1231_v63 }
0x109b   :  { %v1326_v7 = vor.u32 1.1754944e-38, %v1325_v44  ;;  %vm1324_vm8 = vcmp.eq.f32.partialorder %v1323_v1, 8.507059e+37 }
0x109c   :  { %v1233_v6 = vadd.f32 %v1722_v60, %v1232_v3 }
0x109e   :  { %v1237_v10 = vsel %vm1236_vm3, %v1722_v60, %v1233_v6 }
0x109f   :  { %v1242_v12 = vsel %vm1239_vm4, %v1241_v8, %v1237_v10  ;;  %v1726_v52 = vpop.eup %1725 }
0x10a0   :  { %v1265_v16 = vmul.f32 %v1263_v49, %v1242_v12  ;;  %v1315_v29 = vmul.f32 %v1726_v52, %v1313_v27  ;;  %vm1320_vm5 = vweird.f32 %v1726_v52  ;;  %v1257_v23 = vsub.f32 1.0, %v1242_v12 }
0x10a1   :  { %vm1321_vm7 = vmor %vm1319_vm6, %vm1320_vm5 }
0x10a2   :  { %v1316_v62 = vsub.f32 1.0, %v1315_v29 }
0x10a4   :  { %v1317_v32 = vmul.f32 %v1726_v52, %v1316_v62 }
0x10a6   :  { %v1318_v33 = vadd.f32 %v1726_v52, %v1317_v32 }
0x10a8   :  { %v1322_v9 = vsel %vm1321_vm7, %v1726_v52, %v1318_v33 }
0x10a9   :  { %v1327_v36 = vsel %vm1324_vm8, %v1326_v7, %v1322_v9 }
0x10aa   :  { %v1341_v11 = vsub.f32 1.0, %v1327_v36  ;;  %v1347_v42 = vmul.f32 %v1327_v36, %v2324_v4 }
0x10de   :  { %v1248_v31 = vpop.permute.xlu2 %1247 }
0x10df   :  { %v1250_v41 = vmul.f32 %v1248_v31, %v1242_v12 }
0x10e1   :  { %1252 = vrot.lane.b32.xlu1 %v1250_v41, %s1791_s27 }
0x10ec   :  { %v1332_v34 = vpop.permute.xlu1 %1331 }
0x10ed   :  { %v1334_v39 = vmul.f32 %v1332_v34, %v1327_v36 }
0x10ef   :  { %1336 = vrot.lane.b32.xlu0 %v1334_v39, %s1791_s27 }
0x1153   :  { %v1253_v2 = vpop.permute.xlu1 %1252 }
0x1154   :  { %v1255_v13 = vadd.f32 %v1253_v2, %v2246_v37 }
0x1156   :  { %1727 = vtanh.f32 %v1255_v13 }
0x115c   :  { %v1728_v14 = vpop.eup %1727 }
0x115d   :  { %1259 = vrot.lane.b32.xlu0 %v1728_v14, %s1793_s15 }
0x1161   :  { %v1337_v26 = vpop.permute.xlu0 %1336 }
0x1162   :  { %v1339_v15 = vadd.f32 %v1337_v26, %v1285_v18 }
0x1164   :  { %1729 = vtanh.f32 %v1339_v15 }
0x116a   :  { %v1730_v38 = vpop.eup %1729 }
0x116b   :  { %1343 = vrot.lane.b32.xlu2 %v1730_v38, %s1793_s15 }
0x11c5   :  { %v1344_v30 = vpop.permute.xlu2 %1343 }
0x11c6   :  { %v1346_v22 = vmul.f32 %v1344_v30, %v1341_v11 }
0x11c8   :  { %v1348_v40 = vadd.f32 %v1347_v42, %v1346_v22 }
0x11ca   :  { %1350 = vrot.lane.b32.xlu1 %v1348_v40, %s1793_s15 }
0x11cf   :  { %v1260_v37 = vpop.permute.xlu0 %1259 }
0x11d0   :  { %v1262_v24 = vmul.f32 %v1260_v37, %v1257_v23 }
0x11d2   :  { %v1266_v43 = vadd.f32 %v1265_v16, %v1262_v24 }
0x11d4   :  { %v1355_v46 = vrot.slane %v1266_v43, 6 }
0x11d6   :  { %1356 = vrot.lane.b32.xlu2 %v1355_v46, %s1793_s15 }
0x1230   :  { %v1357_v47 = vpop.permute.xlu2 %1356 }
0x1231   :  { %1618 = vmatmul.msk.f32.vlgmr.msra.gmra.mxu0 %vm163_vm0, %v1357_v47 }
0x123c   :  { %v1351_v50 = vpop.permute.xlu1 %1350 }
0x123d   :  { %1353 = vst.msk [vmem:[#allocation2 + $0xc] sm:$0x3] %vm404_vm15, %v1351_v50  ;;  %1619 = vmatmul.msk.f32.vlgmr.msra.gmra.mxu1 %vm163_vm0, %v1351_v50 }
0x12ae   :  { %v1377_v53 = vpop.f32.mrf.mxu0 }
0x12af   :  { %v1378_v54 = vadd.f32 %v1737_v17, %v1377_v53 }
0x12ba   :  { %v1399_v4 = vpop.f32.mrf.mxu1 }
0x12bb   :  { %v1422_v51 = vadd.f32 %v1399_v4, %v2120_v35  ;;  %v1402_v48 = vadd.f32 %v1399_v4, %v1378_v54 }
0x12bd   :  { %1424 = vrot.lane.b32.xlu0 %v1422_v51, %s1791_s27  ;;  %v1620_v55 = vmul.f32 -1.442695, %v1402_v48 }
0x12bf   :  { %1731 = vpow2.f32 %v1620_v55 }
0x12c5   :  { %v1732_v56 = vpop.eup %1731 }
0x12c6   :  { %v1406_v57 = vadd.f32 1.0, %v1732_v56 }
0x12c8   :  { %1733 = vrcp.f32 %v1406_v57  ;;  %v1418_v0 = vand.u32 2147483648, %v1406_v57  ;;  %vm1412_vm10 = vweird.f32 %v1406_v57  ;;  %v1416_v3 = vand.u32 2147483647, %v1406_v57 }
0x12ca   :  { %v1419_v5 = vor.u32 1.1754944e-38, %v1418_v0  ;;  %vm1417_vm12 = vcmp.eq.f32.partialorder %v1416_v3, 8.507059e+37 }
0x12ce   :  { %v1734_v59 = vpop.eup %1733 }
0x12cf   :  { %v1408_v45 = vmul.f32 %v1734_v59, %v1406_v57  ;;  %vm1413_vm9 = vweird.f32 %v1734_v59 }
0x12d0   :  { %vm1414_vm11 = vmor %vm1412_vm10, %vm1413_vm9 }
0x12d1   :  { %v1409_v60 = vsub.f32 1.0, %v1408_v45 }
0x12d3   :  { %v1410_v61 = vmul.f32 %v1734_v59, %v1409_v60 }
0x12d5   :  { %v1411_v63 = vadd.f32 %v1734_v59, %v1410_v61 }
0x12d7   :  { %v1415_v35 = vsel %vm1414_vm11, %v1734_v59, %v1411_v63 }
0x12d8   :  { %v1420_v8 = vsel %vm1417_vm12, %v1419_v5, %v1415_v35 }
0x12d9   :  { %v1434_v18 = vsub.f32 1.0, %v1420_v8  ;;  %v1440_v20 = vmul.f32 %v1420_v8, %v1348_v40 }
0x132f   :  { %v1425_v6 = vpop.permute.xlu0 %1424 }
0x1330   :  { %v1427_v49 = vmul.f32 %v1425_v6, %v1420_v8 }
0x1332   :  { %1429 = vrot.lane.b32.xlu1 %v1427_v49, %s1791_s27  ;;  %s1543_s27 = sshll.u32 %s1795_s4, 4  ;;  %s1544_s27 = int_to_ptr.vmem [resolvable:$true] %s1543_s27 }
0x133a   :  { %1519 = vrot.lane.b32.xlu1 %v1266_v43, %s1793_s15 }
0x13a4   :  { %v1430_v10 = vpop.permute.xlu1 %1429 }
0x13a5   :  { %v1432_v12 = vadd.f32 %v1430_v10, %v1378_v54 }
0x13a7   :  { %1735 = vtanh.f32 %v1432_v12 }
0x13ac   :  { %v1520_v16 = vpop.permute.xlu1 %1519 }
0x13ad   :  { %v1736_v17 = vpop.eup %1735  ;;  %1523 = vst.msk [vmem:[#allocation5 - $0x6] sm:$0xc0] %vm1522_vm13, %v1520_v16 }
0x13ae   :  { %1436 = vrot.lane.b32.xlu2 %v1736_v17, %s1793_s15 }
0x1408   :  { %v1437_v19 = vpop.permute.xlu2 %1436 }
0x1409   :  { %v1439_v21 = vmul.f32 %v1437_v19, %v1434_v18 }
0x140b   :  { %v1441_v27 = vadd.f32 %v1440_v20, %v1439_v21 }
0x140d   :  { %1443 = vrot.lane.b32.xlu0 %v1441_v27, %s1793_s15  ;;  %s1797_s15 = smov [#allocation3]  }
0x140e   :  { %s1530_s18 = sshll.u32 %s1797_s15, 4  ;;  %s1531_s18 = int_to_ptr.vmem [resolvable:$true] %s1530_s18 }
0x147f   :  { %v1444_v52 = vpop.permute.xlu0 %1443 }
0x1480   :  { %1446 = vst.msk [vmem:[#allocation2 + $0xe] sm:$0x3] %vm404_vm15, %v1444_v52 }
0x1481   :  { %1525 = vst.msk [vmem:[#allocation5 + $0x2] sm:$0x3] %vm404_vm15, %v1444_v52 }
0x1482   :  { %1551 = dma.vmem_to_hbm [thread:$0]  %s1544_s27, 64, %s1546_s8, [#allocation6], %s1794_s16, %s1794_s16, %s1796_s17  }
0x1483   :  { %s1799_s16 = smov 16  }
0x1487   :  { %v1448_v29 = vld [vmem:[#allocation2 + $0x8] sm:$0xff] }
0x1488   :  { %1622 = vmatmul.msk.f32.gmra.mxu2 %vm163_vm0, %v1448_v29  ;;  %1624 = vmatmul.msk.f32.gmra.mxu3 %vm163_vm0, %v1448_v29 }
0x150b   :  { %v1489_v62 = vpop.f32.mrf.mxu2  ;;  %v1512_v31 = vpop.f32.mrf.mxu3 }
0x150c   :  { %v1490_v41 = vadd.f32 %v1489_v62, %v1459_v58  ;;  %v1513_v32 = vadd.f32 %v1512_v31, %v1460_v25 }
0x150e   :  { %1517 = vst [vmem:[#allocation3 + $0x10] sm:$0xff] %v1490_v41 }
0x150f   :  { %1518 = vst [vmem:[#allocation3 + $0x18] sm:$0xff] %v1513_v32 }
0x1510   :  { %1538 = dma.vmem_to_hbm [thread:$0]  %s1531_s18, 512, %s1533_s20, [#allocation4], %s1798_s10, %s1798_s10, %s1799_s16  }
0x1511   :  { %1786 = dma.done.wait [#allocation4], 512  }
0x1512   :  { %1787 = vsyncadd [#allocation4], 4294966784 }
0x1513   :  { %1788 = dma.done.wait [#allocation6], 64  }
0x1514   :  { %1789 = vsyncadd [#allocation6], 4294967232 }
0x1515   :  { %1560 = vsyncpa [#allocation4], 1 }
0x1516   :  { %1561 = vsyncpa [#allocation6], 1 }

</bundles_post_ra>
